<compile_context>
chip_gen: v7x
topology: tpu7x:2x2x1
jax: 0.10.0
libtpu: 0.0.40
codegen_flags: <defaults>
</compile_context>

<pallas_src>
import numpy as np
import jax
import jax.numpy as jnp
from jax import lax
from jax.experimental import pallas as pl
from jax.experimental.pallas import tpu as pltpu

BN_EPS = 1e-5


# ---------------------------------------------------------------------------
# Tiling helper (corrected VMEM accounting)
# ---------------------------------------------------------------------------

def _pick_row_tile(N, H, W, cin, n_mm_cols, c_out_last,
                   in_bytes, wt_bytes, out_bytes,
                   target_rows=1024, vmem_budget=16 * 1024 * 1024, row_align=8):
    """Pick th (divisor of H) so tm = th*W is sublane-aligned, <= ~target_rows and the
    per-step VMEM footprint (double-buffered tiles + resident operands) fits the budget.
    Returns None if no aligned divisor tile exists (caller falls back to one block)."""
    # Grid-invariant operands (constant index maps) are resident, NOT double-buffered.
    resident = cin * n_mm_cols * wt_bytes + n_mm_cols * 4

    def block_bytes(th):
        tm = th * W
        return (2 * tm * cin * in_bytes                       # input tile  (x2: dbl-buffer)
                + 2 * th * 2 * W * c_out_last * out_bytes     # output tile (x2: dbl-buffer)
                + resident                                    # weights + bias (resident)
                + tm * n_mm_cols * 4                          # f32 matmul/epilogue values
                + tm * c_out_last * out_bytes)                # cast result before stores

    aligned = [th for th in range(1, H + 1)
               if H % th == 0 and (th * W) % row_align == 0]
    if not aligned:
        return None

    in_budget = [th for th in aligned
                 if th * W <= max(target_rows, W) and block_bytes(th) <= vmem_budget]
    cands = in_budget if in_budget else [min(aligned)]   # smallest aligned tile as fallback

    if N == 1:
        # v7x megacore: keep at least 2 grid steps so both TensorCores get work.
        multi = [th for th in cands if H // th >= 2]
        if multi:
            cands = multi
    return max(cands)


# ---------------------------------------------------------------------------
# Fused Pallas kernel: 1x1 conv (scale folded) + bias + swish + nearest x2 upsample
# ---------------------------------------------------------------------------

def conv1x1_bn_swish_upsample2(x_nhwc, w_mm, scale, bias, *,
                               compute_dtype=jnp.bfloat16, out_dtype=None,
                               precision=None,
                               target_rows=1024,
                               vmem_budget=16 * 1024 * 1024,
                               vmem_limit_bytes=32 * 1024 * 1024):
    """x_nhwc: [N,H,W,Cin]; w_mm: [Cin,Cout]; scale/bias: [Cout] (folded eval-mode BN).
    Returns [N, 2H, 2W, Cout] in out_dtype (defaults to x dtype; pass bf16 to halve the
    dominant HBM writeback if downstream accepts bf16 activations)."""
    N, H, W, Cin = x_nhwc.shape
    Cout = w_mm.shape[1]
    in_dtype = x_nhwc.dtype
    out_dtype = out_dtype or in_dtype
    C2 = 2 * Cout

    # Fold BN scale into the matmul weights (exact for eval-mode BN).
    w_scaled = (w_mm * scale[None, :].astype(w_mm.dtype)).astype(compute_dtype)

    use_dup = (Cout % 128 != 0)
    if use_dup:
        # Thin heads: duplicate along output channels so lanes [0:Cout] and [Cout:2Cout]
        # carry the same value -> lane-dense width-x2 row straight out of the MXU.
        w_k = jnp.concatenate([w_scaled, w_scaled], axis=1)            # [Cin, 2*Cout]
        b_k = jnp.concatenate([bias, bias], axis=0).reshape(1, C2).astype(jnp.float32)
        n_cols = C2
    else:
        # Cout % 128 == 0: no duplication; width-x2 becomes two lane-aligned stores.
        w_k = w_scaled                                                 # [Cin, Cout]
        b_k = bias.reshape(1, Cout).astype(jnp.float32)
        n_cols = Cout

    x_flat = x_nhwc.reshape(N * H * W, Cin)   # free reshape; dtype cast happens in-kernel

    in_bytes = jnp.dtype(in_dtype).itemsize
    wt_bytes = jnp.dtype(compute_dtype).itemsize
    out_bytes = jnp.dtype(out_dtype).itemsize
    row_align = max(8, 32 // in_bytes)        # 8 rows for f32 input, 16 for bf16, 32 for int8

    th = _pick_row_tile(N, H, W, Cin, n_cols, C2, in_bytes, wt_bytes, out_bytes,
                        target_rows=target_rows, vmem_budget=vmem_budget,
                        row_align=row_align)

    if th is not None:
        n_h = H // th
        x_block = (th * W, Cin)
        o_block = (th, 2, W, C2)
        grid = (N, n_h)
        x_map = lambda n, i: (n * n_h + i, 0)
        o_map = lambda n, i: (n * n_h + i, 0, 0, 0)
    else:
        # No sublane-aligned divisor tile for this (H, W): single whole-array block
        # (always layout-legal).  Fine for small maps; pad W upstream for big ones.
        x_block = (N * H * W, Cin)
        o_block = (N * H, 2, W, C2)
        grid = (1, 1)
        x_map = lambda n, i: (0, 0)
        o_map = lambda n, i: (0, 0, 0, 0)

    # TODO(synk): if profiling shows exposed input DMA for very thin Cin, add
    # pipeline_mode=pl.Buffered(3) on the x_flat BlockSpec.

    def kernel(x_ref, w_ref, b_ref, o_ref):
        th_, _, W_, _ = o_ref.shape
        x = x_ref[...]
        if x.dtype != compute_dtype:
            x = x.astype(compute_dtype)                         # in-kernel operand cast
        y = jnp.dot(x, w_ref[...],
                    preferred_element_type=jnp.float32, precision=precision)
        y = y + b_ref[...]                                      # folded-BN bias (f32)
        y = y * jax.nn.sigmoid(y)                               # swish (f32 epilogue)
        y = y.reshape(th_, W_, n_cols).astype(o_ref.dtype)      # cast ONCE
        if use_dup:
            # lanes already hold [y, y] (width x2); height x2 = two stores.
            o_ref[:, 0, :, :] = y
            o_ref[:, 1, :, :] = y
        else:
            # Cout % 128 == 0: four lane-aligned full-width stores (width & height x2).
            o_ref[:, 0, :, :Cout] = y
            o_ref[:, 0, :, Cout:] = y
            o_ref[:, 1, :, :Cout] = y
            o_ref[:, 1, :, Cout:] = y

    out_flat = pl.pallas_call(
        kernel,
        out_shape=jax.ShapeDtypeStruct((N * H, 2, W, C2), out_dtype),
        grid_spec=pltpu.PrefetchScalarGridSpec(
            num_scalar_prefetch=0,
            grid=grid,
            in_specs=[
                pl.BlockSpec(x_block, x_map),
                pl.BlockSpec((Cin, n_cols), lambda n, i: (0, 0)),
                pl.BlockSpec((1, n_cols), lambda n, i: (0, 0)),
            ],
            out_specs=pl.BlockSpec(o_block, o_map),
        ),
        compiler_params=pltpu.CompilerParams(
            dimension_semantics=("parallel", "parallel"),
            vmem_limit_bytes=vmem_limit_bytes),
    )(x_flat, w_k, b_k)

    # Free row-major reshape:
    #   (N*H, 2, W, 2*Cout) == (N, H, 2, W, 2, Cout) == (N, 2H, 2W, Cout)
    return out_flat.reshape(N, 2 * H, 2 * W, Cout)


# ---------------------------------------------------------------------------
# Module wrappers
# ---------------------------------------------------------------------------

def fold_bn(gamma, beta, mean, var, eps=BN_EPS):
    scale = gamma / jnp.sqrt(var + eps)
    return scale, beta - mean * scale


def upsample_forward_nhwc(x_nhwc, params, **kw):
    """Production path: NHWC in -> NHWC out, NO layout transposes (keep the net NHWC)."""
    w = params["w"]                                   # [Cout, Cin, 1, 1]
    Cout, Cin = w.shape[:2]
    scale, bias = fold_bn(params["gamma"], params["beta"], params["mean"], params["var"])
    w_mm = w.reshape(Cout, Cin).T                     # [Cin, Cout]
    return conv1x1_bn_swish_upsample2(x_nhwc, w_mm, scale, bias, **kw)


def upsample_forward(x_nchw, params, **kw):
    """PyTorch-compatible NCHW wrapper.  The two transposes here are boundary-only;
    prefer upsample_forward_nhwc inside an NHWC network (the output-side transpose
    moves 4x the input's spatial elements through HBM)."""
    x_nhwc = jnp.transpose(x_nchw, (0, 2, 3, 1))
    y = upsample_forward_nhwc(x_nhwc, params, **kw)
    return jnp.transpose(y, (0, 3, 1, 2))


# ---------------------------------------------------------------------------
# Deterministic parameters & pure-JAX reference
# ---------------------------------------------------------------------------

def init_params(key, in_channels, out_channels):
    k1, k2, k3, k4, k5 = jax.random.split(key, 5)
    w = jax.random.normal(k1, (out_channels, in_channels, 1, 1), jnp.float32) / np.sqrt(in_channels)
    gamma = 1.0 + 0.1 * jax.random.normal(k2, (out_channels,), jnp.float32)
    beta = 0.1 * jax.random.normal(k3, (out_channels,), jnp.float32)
    mean = 0.1 * jax.random.normal(k4, (out_channels,), jnp.float32)
    var = 1.0 + 0.5 * jax.random.uniform(k5, (out_channels,), jnp.float32)
    return {"w": w, "gamma": gamma, "beta": beta, "mean": mean, "var": var}


def ref_forward(x_nchw, params):
    """Mirrors the PyTorch forward (eval-mode BN) in plain JAX/XLA."""
    scale, bias = fold_bn(params["gamma"], params["beta"], params["mean"], params["var"])
    y = lax.conv_general_dilated(
        x_nchw, params["w"], (1, 1), [(0, 0), (0, 0)],
        dimension_numbers=("NCHW", "OIHW", "NCHW"),
        precision=lax.Precision.HIGHEST)
    y = y * scale.reshape(1, -1, 1, 1) + bias.reshape(1, -1, 1, 1)
    y = y * jax.nn.sigmoid(y)                                  # swish
    return jnp.repeat(jnp.repeat(y, 2, axis=2), 2, axis=3)     # nearest x2


# ---------------------------------------------------------------------------

if __name__ == "__main__":
    key = jax.random.PRNGKey(0)

    # ---- Case 1: thin heads (Cout < 128, weight-duplication path) ---------------
    in_channels, out_channels = 4, 8
    kx, kp, kx2, kp2 = jax.random.split(key, 4)
    x = jax.random.normal(kx, (2, in_channels, 16, 16), jnp.float32)   # NCHW
    params = init_params(kp, in_channels, out_channels)
    ref = jax.block_until_ready(ref_forward(x, params))

    # f32 compute, HIGHEST precision: tight numerical validation of the NCHW wrapper.
    fwd_f32 = jax.jit(lambda xx: upsample_forward(
        xx, params, compute_dtype=jnp.float32, precision=lax.Precision.HIGHEST))
    out_f32 = jax.block_until_ready(fwd_f32(x))
    assert out_f32.shape == (2, out_channels, 32, 32), out_f32.shape
    np.testing.assert_allclose(np.asarray(out_f32), np.asarray(ref), rtol=1e-5, atol=1e-5)

    # Production default: bf16 matmul operands (MXU-native), f32 accumulation/epilogue.
    fwd_bf16 = jax.jit(lambda xx: upsample_forward(xx, params))
    out_bf16 = jax.block_until_ready(fwd_bf16(x))
    np.testing.assert_allclose(np.asarray(out_bf16), np.asarray(ref), rtol=5e-2, atol=5e-2)

    # NHWC production entry point (no transposes), validated against transposed ref.
    x_nhwc = jnp.transpose(x, (0, 2, 3, 1))
    fwd_nhwc = jax.jit(lambda xx: upsample_forward_nhwc(xx, params))
    out_nhwc = jax.block_until_ready(fwd_nhwc(x_nhwc))
    np.testing.assert_allclose(np.asarray(out_nhwc),
                               np.asarray(jnp.transpose(ref, (0, 2, 3, 1))),
                               rtol=5e-2, atol=5e-2)

    # ---- Case 2: Cout % 128 == 0 (no-duplication, lane-aligned two-store path) ---
    cin2, cout2 = 32, 128
    x2 = jax.random.normal(kx2, (1, cin2, 16, 16), jnp.float32)        # NCHW, N=1 -> n_h>=2
    params2 = init_params(kp2, cin2, cout2)
    ref2 = jax.block_until_ready(ref_forward(x2, params2))

    fwd2_f32 = jax.jit(lambda xx: upsample_forward(
        xx, params2, compute_dtype=jnp.float32, precision=lax.Precision.HIGHEST))
    out2_f32 = jax.block_until_ready(fwd2_f32(x2))
    assert out2_f32.shape == (1, cout2, 32, 32), out2_f32.shape
    np.testing.assert_allclose(np.asarray(out2_f32), np.asarray(ref2), rtol=1e-5, atol=1e-5)

    fwd2_bf16 = jax.jit(lambda xx: upsample_forward(xx, params2))
    out2_bf16 = jax.block_until_ready(fwd2_bf16(x2))
    np.testing.assert_allclose(np.asarray(out2_bf16), np.asarray(ref2), rtol=5e-2, atol=5e-2)

    print("KERNEL_OK")
</pallas_src>

<mosaic_0001>
module attributes {stable_mosaic.version = 11 : i64} {
  func.func @kernel(%arg0: i32, %arg1: i32, %arg2: memref<256x4xf32, #tpu.memory_space<vmem>>, %arg3: memref<4x16xf32, #tpu.memory_space<vmem>>, %arg4: memref<1x16xf32, #tpu.memory_space<vmem>>, %arg5: memref<16x2x16x16xf32, #tpu.memory_space<vmem>>) attributes {dimension_semantics = [#tpu.dimension_semantics<parallel>, #tpu.dimension_semantics<parallel>], iteration_bounds = array<i64: 2, 1>, scalar_prefetch = 0 : i64, scratch_operands = 0 : i64, tpu.core_type = #tpu.core_type<tc>, window_params = [{transform_indices = @transform_0, window_bounds = array<i64: 256, 4>}, {pipeline_mode = #tpu.pipeline_mode<synchronous>, transform_indices = @transform_1, window_bounds = array<i64: 4, 16>}, {pipeline_mode = #tpu.pipeline_mode<synchronous>, transform_indices = @transform_2, window_bounds = array<i64: 1, 16>}, {transform_indices = @transform_3, window_bounds = array<i64: 16, 2, 16, 16>}]} {
    %c0 = arith.constant 0 : index
    %c0_0 = arith.constant 0 : index
    %0 = vector.load %arg2[%c0, %c0_0] : memref<256x4xf32, #tpu.memory_space<vmem>>, vector<256x4xf32>
    %c0_1 = arith.constant 0 : index
    %c0_2 = arith.constant 0 : index
    %1 = vector.load %arg3[%c0_1, %c0_2] : memref<4x16xf32, #tpu.memory_space<vmem>>, vector<4x16xf32>
    %cst = arith.constant dense<0.000000e+00> : vector<256x16xf32>
    %2 = tpu.matmul %0, %1, %cst {dimension_numbers = #tpu.dot_dimension_numbers<[1], [0], [0], [1], [0, 0, 1, 1], [], []>, precision = #tpu.contract_precision<fp32>} : vector<256x4xf32>, vector<4x16xf32>, vector<256x16xf32> -> vector<256x16xf32>
    %c0_3 = arith.constant 0 : index
    %c0_4 = arith.constant 0 : index
    %3 = vector.load %arg4[%c0_3, %c0_4] : memref<1x16xf32, #tpu.memory_space<vmem>>, vector<1x16xf32>
    %4 = vector.broadcast %3 : vector<1x16xf32> to vector<256x16xf32>
    %5 = arith.addf %2, %4 : vector<256x16xf32>
    %6 = arith.negf %5 : vector<256x16xf32>
    %7 = math.exp %6 : vector<256x16xf32>
    %cst_5 = arith.constant 1.000000e+00 : f32
    %8 = vector.broadcast %cst_5 : f32 to vector<256x16xf32>
    %9 = arith.addf %8, %7 : vector<256x16xf32>
    %10 = arith.divf %8, %9 : vector<256x16xf32>
    %11 = arith.mulf %5, %10 : vector<256x16xf32>
    %12 = vector.shape_cast %11 : vector<256x16xf32> to vector<16x16x16xf32>
    %c0_6 = arith.constant 0 : index
    %c0_7 = arith.constant 0 : index
    %c0_8 = arith.constant 0 : index
    %c0_9 = arith.constant 0 : index
    %13 = vector.load %arg5[%c0_6, %c0_7, %c0_8, %c0_9] : memref<16x2x16x16xf32, #tpu.memory_space<vmem>>, vector<16x1x16x16xf32>
    %14 = vector.shape_cast %13 : vector<16x1x16x16xf32> to vector<16x16x16xf32>
    %15 = vector.shape_cast %12 : vector<16x16x16xf32> to vector<16x1x16x16xf32>
    tpu.vector_store %arg5[%c0_6, %c0_7, %c0_8, %c0_9], %15 {strides = array<i32>} : memref<16x2x16x16xf32, #tpu.memory_space<vmem>>, vector<16x1x16x16xf32>,
    %c0_10 = arith.constant 0 : index
    %c1 = arith.constant 1 : index
    %c0_11 = arith.constant 0 : index
    %c0_12 = arith.constant 0 : index
    %16 = vector.load %arg5[%c0_10, %c1, %c0_11, %c0_12] : memref<16x2x16x16xf32, #tpu.memory_space<vmem>>, vector<16x1x16x16xf32>
    %17 = vector.shape_cast %16 : vector<16x1x16x16xf32> to vector<16x16x16xf32>
    %18 = vector.shape_cast %12 : vector<16x16x16xf32> to vector<16x1x16x16xf32>
    tpu.vector_store %arg5[%c0_10, %c1, %c0_11, %c0_12], %18 {strides = array<i32>} : memref<16x2x16x16xf32, #tpu.memory_space<vmem>>, vector<16x1x16x16xf32>,
    return
  }
  func.func @transform_0(%arg0: i32, %arg1: i32) -> (i32, i32) {
    %c1_i32 = arith.constant 1 : i32
    %0 = arith.muli %arg0, %c1_i32 : i32
    %1 = arith.addi %0, %arg1 : i32
    %c0_i32 = arith.constant 0 : i32
    %c0_i32_0 = arith.constant 0 : i32
    return %1, %c0_i32 : i32, i32
  }
  func.func @transform_1(%arg0: i32, %arg1: i32) -> (i32, i32) {
    %c0_i32 = arith.constant 0 : i32
    %c0_i32_0 = arith.constant 0 : i32
    %c0_i32_1 = arith.constant 0 : i32
    return %c0_i32, %c0_i32_0 : i32, i32
  }
  func.func @transform_2(%arg0: i32, %arg1: i32) -> (i32, i32) {
    %c0_i32 = arith.constant 0 : i32
    %c0_i32_0 = arith.constant 0 : i32
    %c0_i32_1 = arith.constant 0 : i32
    return %c0_i32, %c0_i32_0 : i32, i32
  }
  func.func @transform_3(%arg0: i32, %arg1: i32) -> (i32, i32, i32, i32) {
    %c1_i32 = arith.constant 1 : i32
    %0 = arith.muli %arg0, %c1_i32 : i32
    %1 = arith.addi %0, %arg1 : i32
    %c0_i32 = arith.constant 0 : i32
    %c0_i32_0 = arith.constant 0 : i32
    %c0_i32_1 = arith.constant 0 : i32
    %c0_i32_2 = arith.constant 0 : i32
    return %1, %c0_i32, %c0_i32_0, %c0_i32_1 : i32, i32, i32, i32
  }
}

</mosaic_0001>

<bundles_post_ra>
// kernel: _lambda_.1
= control target key start
LH: loop header
LB: loop body
LE: loop exit
PB: predicated region body
PF: predicated region fallthrough
CT: control target
= control target key end

     0   :  { %s3444_s12 = smov 0   ;;  %s3446_s13 = smov 0   ;;  %s4225_s0 = inlined_call_operand.vmem [shape: f32[512,4], index: 0, kind: input, shape index: {}]   ;;  %s4226_s1 = inlined_call_operand.vmem [shape: f32[4,16], index: 1, kind: input, shape index: {}]   ;;  %s4227_s2 = inlined_call_operand.vmem [shape: f32[1,16], index: 2, kind: input, shape index: {}]   ;;  %s4228_s3 = inlined_call_operand.vmem [shape: f32[32,2,16,16], index: 3, kind: output, shape index: {}]  }
   0x1   :  { %s3448_s14 = smov 0  }
   0x2 LB: > { %s25_s15 = sadd.s32 1, %s3418_s13  ;;  %p2484_p0 = scmp.ge.s32.totalorder %s3422_s14, 1  ;;  %s3422_s14 = sphi %s3448_s14, %s13_s14   ;;  %s3418_s13 = sphi %s3446_s13, %s4285_s13   ;;  %s3414_s12 = sphi %s3444_s12, %s4284_s12  }
   0x3   : > { %p27_p1 = scmp.ge.s32.totalorder %s25_s15, 2  ;;  %p156_p2 = scmp.lt.s32.totalorder %s3422_s14, 3 }
   0x5   : > { %s4287_s15 = smov (%p27_p1, %s25_s15), 0  ;;  %p157_p3 = pnand %p2484_p0, %p156_p2 }
   0x7   : > { %160 = sbr.rel (%p157_p3) target bundleno = 471 (0x1d7), region = 32 }
   0xe   : > { %v232_v0 = vld [vmem:[%s4226_s1] sm:$0xf]  ;;  %vm337_vm0 = vcmask 1043456   ;;  %s2485_s18 = sshll.u32 %s3414_s12, 5  ;;  %vm240_vm1 = vcmask 31744   ;;  %s2487_s25 = sshll.u32 %s3414_s12, 4 }
   0xf   : > { %v339_v1 = vsel %vm337_vm0, %v232_v0, 0  ;;  %p185_p4 = scmp.lt.s32.totalorder %s2485_s18, 63  ;;  %p3946_p5 = scmp.lt.s32.totalorder %s2487_s25, 31  ;;  %vm2344_vm2 = vcmask 130048  }
  0x10   : > { %v3468_v2 = vand.u32 4294901760, %v339_v1 }
  0x11   : > { %s4289_s18 = smov (!%p185_p4, %s2485_s18), 63  ;;  %s4291_s25 = smov (!%p3946_p5, %s2487_s25), 31 }
  0x12   : > { %2906 = vmatprep.subr.mxu0 %v3468_v2  ;;  %2756 = vmatprep.subr.mxu1 %v3468_v2  ;;  %v3473_v3 = vsub.f32 %v339_v1, %v3468_v2  ;;  %s2486_s19 = sshll.u32 %s4289_s18, 3  ;;  %s2557_s27 = sshll.u32 %s4291_s25, 5 }
  0x13   : > { %2907 = vmatpush3.msra.mxu0 %v3468_v2  ;;  %2757 = vmatpush3.msra.mxu1 %v3468_v2  ;;  %s3480_s22 = scalar_lea.vmem %s4225_s0, %s2486_s19  ;;  %s3982_s30 = scalar_lea.vmem %s4228_s3, %s2557_s27 }
  0x14   : > { %v730_v4 = vand.u32 4294901760, %v3473_v3  ;;  %v200_v5 = vld [vmem:[%s3480_s22] sm:$0xff]  ;;  %v201_v6 = vld [vmem:[%s3480_s22 + $0x8] sm:$0xff]  ;;  %v202_v7 = vld [vmem:[%s3480_s22 + $0x10] sm:$0xff] }
  0x15   : > { %v242_v8 = vsel %vm240_vm1, %v200_v5, 0  ;;  %v245_v9 = vsel %vm240_vm1, %v201_v6, 0  ;;  %v248_v11 = vsel %vm240_vm1, %v202_v7, 0  ;;  %v203_v12 = vld [vmem:[%s3480_s22 + $0x18] sm:$0xff]  ;;  %v204_v13 = vld [vmem:[%s3480_s22 + $0x20] sm:$0xff]  ;;  %v205_v14 = vld [vmem:[%s3480_s22 + $0x28] sm:$0xff] }
  0x16   : > { %v731_v10 = vsub.f32 %v3473_v3, %v730_v4  ;;  %2956 = vmatprep.subr.mxu0 %v730_v4  ;;  %v3493_v15 = vand.u32 4294901760, %v242_v8  ;;  %v3495_v16 = vand.u32 4294901760, %v245_v9  ;;  %v3497_v17 = vand.u32 4294901760, %v248_v11  ;;  %v206_v19 = vld [vmem:[%s3480_s22 + $0x30] sm:$0xff]  ;;  %v207_v20 = vld [vmem:[%s3480_s22 + $0x38] sm:$0xff]  ;;  %v208_v49 = vld [vmem:[%s3480_s22 + $0x40] sm:$0xff] }
  0x17   : > { %v251_v18 = vsel %vm240_vm1, %v203_v12, 0  ;;  %v254_v23 = vsel %vm240_vm1, %v204_v13, 0  ;;  %v257_v24 = vsel %vm240_vm1, %v205_v14, 0  ;;  %v260_v31 = vsel %vm240_vm1, %v206_v19, 0  ;;  %v209_v50 = vld [vmem:[%s3480_s22 + $0x48] sm:$0xff]  ;;  %v210_v51 = vld [vmem:[%s3480_s22 + $0x50] sm:$0xff] }
  0x18   : > { %v732_v21 = vand.u32 4294901760, %v731_v10  ;;  %v3502_v22 = vand.u32 4294901760, %v251_v18  ;;  %v3507_v25 = vsub.f32 %v242_v8, %v3493_v15  ;;  %v3510_v26 = vsub.f32 %v245_v9, %v3495_v16  ;;  %v211_v59 = vld [vmem:[%s3480_s22 + $0x58] sm:$0xff]  ;;  %v212_v60 = vld [vmem:[%s3480_s22 + $0x60] sm:$0xff]  ;;  %v213_v7 = vld [vmem:[%s3480_s22 + $0x68] sm:$0xff] }
  0x19   : > { %v3513_v27 = vsub.f32 %v248_v11, %v3497_v17  ;;  %v3515_v28 = vand.u32 4294901760, %v254_v23  ;;  %v3520_v30 = vand.u32 4294901760, %v257_v24  ;;  %v263_v32 = vsel %vm240_vm1, %v207_v20, 0  ;;  %v214_v12 = vld [vmem:[%s3480_s22 + $0x70] sm:$0xff] }
  0x1a   : > { %2806 = vmatprep.subr.mxu1 %v732_v21  ;;  %v3518_v29 = vsub.f32 %v251_v18, %v3502_v22  ;;  %v409_v33 = vand.u32 4294901760, %v3507_v25  ;;  %v419_v34 = vand.u32 4294901760, %v3510_v26  ;;  %v3534_v39 = vand.u32 4294901760, %v260_v31 }
  0x1b   : > { %v429_v35 = vand.u32 4294901760, %v3513_v27  ;;  %v3528_v36 = vsub.f32 %v254_v23, %v3515_v28  ;;  %v3532_v38 = vsub.f32 %v257_v24, %v3520_v30  ;;  %v3536_v40 = vand.u32 4294901760, %v263_v32 }
  0x1c   : > { %v439_v37 = vand.u32 4294901760, %v3518_v29  ;;  %2908 = vmatprep.mubr.f32.mxu0 %v409_v33  ;;  %v410_v41 = vsub.f32 %v3507_v25, %v409_v33  ;;  %v420_v42 = vsub.f32 %v3510_v26, %v419_v34  ;;  %v3545_v47 = vsub.f32 %v260_v31, %v3534_v39  ;;  %v215_v31 = vld [vmem:[%s3480_s22 + $0x78] sm:$0xff] }
  0x1d   : > { %v430_v43 = vsub.f32 %v3513_v27, %v429_v35  ;;  %v449_v44 = vand.u32 4294901760, %v3528_v36  ;;  %2909 = vmatmul.mubr.f32.vlgmr.msra.gmra.mrb[0].mxu0 %v419_v34  ;;  %v459_v46 = vand.u32 4294901760, %v3532_v38  ;;  %v3548_v48 = vsub.f32 %v263_v32, %v3536_v40 }
  0x1e   : > { %v440_v45 = vsub.f32 %v3518_v29, %v439_v37  ;;  %v411_v52 = vand.u32 4294901760, %v410_v41  ;;  %2911 = vmatprep.mubr.f32.mxu0 %v429_v35  ;;  %v421_v53 = vand.u32 4294901760, %v420_v42  ;;  %2957 = vmatpush3.msra.mxu0 %v730_v4  ;;  %v469_v56 = vand.u32 4294901760, %v3545_v47 }
  0x1f   : > { %4247 = vst [vmem:[#allocation2_spill] sm:$0xff] %v3548_v48  ;;  %v431_v54 = vand.u32 4294901760, %v430_v43  ;;  %v450_v55 = vsub.f32 %v3528_v36, %v449_v44  ;;  %v460_v57 = vsub.f32 %v3532_v38, %v459_v46  ;;  %v479_v58 = vand.u32 4294901760, %v3548_v48  ;;  %3006 = vmatprep.subr.mxu0 %v3468_v2 }
  0x20   : > { %2758 = vmatprep.mubr.f32.mxu1 %v411_v52  ;;  %v441_v61 = vand.u32 4294901760, %v440_v45  ;;  %v266_v62 = vsel %vm240_vm1, %v208_v49, 0  ;;  %v269_v63 = vsel %vm240_vm1, %v209_v50, 0  ;;  %v272_v0 = vsel %vm240_vm1, %v210_v51, 0  ;;  %v216_v52 = vld [vmem:[%s3480_s22 + $0x80] sm:$0xff] }
  0x21   : > { %2759 = vmatmul.mubr.f32.vlgmr.msra.gmra.mrb[0].mxu1 %v421_v53  ;;  %2912 = vmatmul.mubr.f32.gmra.mrb[2].mxu0 %v439_v37  ;;  %v451_v1 = vand.u32 4294901760, %v450_v55  ;;  %v461_v4 = vand.u32 4294901760, %v460_v57  ;;  %v470_v5 = vsub.f32 %v3545_v47, %v469_v56  ;;  %v3564_v6 = vand.u32 4294901760, %v266_v62 }
  0x22   : > { %2807 = vmatpush3.msra.mxu1 %v732_v21  ;;  %2761 = vmatprep.mubr.f32.mxu1 %v431_v54  ;;  %v3567_v8 = vand.u32 4294901760, %v269_v63  ;;  %v3569_v9 = vand.u32 4294901760, %v272_v0  ;;  %v275_v10 = vsel %vm240_vm1, %v211_v59, 0  ;;  %v278_v11 = vsel %vm240_vm1, %v212_v60, 0  ;;  %v218_v60 = vld [vmem:[%s3480_s22 + $0x90] sm:$0xff] }
  0x23   : > { %2914 = vmatprep.mubr.f32.mxu0 %v449_v44  ;;  %v471_v13 = vand.u32 4294901760, %v470_v5  ;;  %v3575_v14 = vsub.f32 %v266_v62, %v3564_v6  ;;  %v480_v18 = vsub.f32 %v3548_v48, %v479_v58  ;;  %v3578_v19 = vand.u32 4294901760, %v275_v10  ;;  %2856 = vmatprep.subr.mxu1 %v3473_v3 }
  0x24   : > { %v3582_v20 = vsub.f32 %v269_v63, %v3567_v8  ;;  %v3585_v21 = vsub.f32 %v272_v0, %v3569_v9  ;;  %v3587_v23 = vand.u32 4294901760, %v278_v11  ;;  %v281_v24 = vsel %vm240_vm1, %v213_v7, 0  ;;  %v220_v7 = vld [vmem:[%s3480_s22 + $0xa0] sm:$0xff] }
  0x25   : > { %4248 = vst [vmem:[#allocation3_spill] sm:$0xff] %v3575_v14  ;;  %2762 = vmatmul.mubr.f32.gmra.mrb[2].mxu1 %v441_v61  ;;  %2915 = vmatmul.mubr.f32.gmra.mrb[4].mxu0 %v459_v46  ;;  %v489_v32 = vand.u32 4294901760, %v3575_v14  ;;  %v3593_v33 = vsub.f32 %v275_v10, %v3578_v19  ;;  %v3595_v34 = vand.u32 4294901760, %v281_v24  ;;  %v284_v35 = vsel %vm240_vm1, %v214_v12, 0 }
  0x26   : > { %4249 = vst [vmem:[#allocation4_spill] sm:$0xff] %v3582_v20  ;;  %4250 = vst [vmem:[#allocation5_spill] sm:$0xff] %v3585_v21  ;;  %2764 = vmatprep.mubr.f32.mxu1 %v451_v1  ;;  %2917 = vmatprep.mubr.f32.mxu0 %v469_v56  ;;  %v499_v37 = vand.u32 4294901760, %v3582_v20  ;;  %v509_v41 = vand.u32 4294901760, %v3585_v21  ;;  %v3601_v42 = vsub.f32 %v278_v11, %v3587_v23  ;;  %v3603_v43 = vand.u32 4294901760, %v284_v35  ;;  %v217_v56 = vld [vmem:[%s3480_s22 + $0x88] sm:$0xff] }
  0x27   : > { %4251 = vst [vmem:[#allocation6_spill] sm:$0xff] %v3593_v33  ;;  %v490_v44 = vsub.f32 %v3575_v14, %v489_v32  ;;  %v519_v45 = vand.u32 4294901760, %v3593_v33  ;;  %v3608_v46 = vsub.f32 %v281_v24, %v3595_v34  ;;  %v287_v49 = vsel %vm240_vm1, %v215_v31, 0  ;;  %v230_v14 = vld [vmem:[%s3480_s22 + $0xf0] sm:$0xff] }
  0x28   : > { %4252 = vst [vmem:[#allocation7_spill] sm:$0xff] %v3601_v42  ;;  %v529_v50 = vand.u32 4294901760, %v3601_v42  ;;  %v3613_v51 = vsub.f32 %v284_v35, %v3603_v43  ;;  %v481_v53 = vand.u32 4294901760, %v480_v18  ;;  %v500_v54 = vsub.f32 %v3582_v20, %v499_v37  ;;  %v221_v35 = vld [vmem:[%s3480_s22 + $0xa8] sm:$0xff] }
  0x29   : > { %4253 = vst [vmem:[#allocation8_spill] sm:$0xff] %v3608_v46  ;;  %2765 = vmatmul.mubr.f32.gmra.mrb[4].mxu1 %v461_v4  ;;  %2918 = vmatmul.mubr.f32.gmra.mrb[6].mxu0 %v479_v58  ;;  %v3617_v55 = vand.u32 4294901760, %v287_v49  ;;  %v491_v57 = vand.u32 4294901760, %v490_v44  ;;  %v510_v59 = vsub.f32 %v3585_v21, %v509_v41  ;;  %v520_v61 = vsub.f32 %v3593_v33, %v519_v45  ;;  %v219_v58 = vld [vmem:[%s3480_s22 + $0x98] sm:$0xff]  ;;  %v222_v44 = vld [vmem:[%s3480_s22 + $0xb0] sm:$0xff] }
  0x2a   : > { %4254 = vst [vmem:[#allocation9_spill] sm:$0xff] %v3613_v51  ;;  %2767 = vmatprep.mubr.f32.mxu1 %v471_v13  ;;  %2920 = vmatprep.mubr.f32.mxu0 %v489_v32  ;;  %v539_v62 = vand.u32 4294901760, %v3608_v46  ;;  %v290_v63 = vsel %vm240_vm1, %v216_v52, 0  ;;  %v530_v0 = vsub.f32 %v3601_v42, %v529_v50  ;;  %v549_v1 = vand.u32 4294901760, %v3613_v51 }
  0x2b   : > { %v3628_v4 = vand.u32 4294901760, %v290_v63  ;;  %v293_v5 = vsel %vm240_vm1, %v217_v56, 0  ;;  %v501_v10 = vand.u32 4294901760, %v500_v54  ;;  %v3633_v11 = vsub.f32 %v287_v49, %v3617_v55 }
  0x2c   : > { %v3635_v12 = vand.u32 4294901760, %v293_v5  ;;  %v296_v13 = vsel %vm240_vm1, %v218_v60, 0  ;;  %v511_v18 = vand.u32 4294901760, %v510_v59  ;;  %v299_v32 = vsel %vm240_vm1, %v219_v58, 0  ;;  %v223_v58 = vld [vmem:[%s3480_s22 + $0xb8] sm:$0xff] }
  0x2d   : > { %2768 = vmatmul.mubr.f32.gmra.mrb[6].mxu1 %v481_v53  ;;  %2921 = vmatmul.mubr.f32.gmra.mrb[8].mxu0 %v499_v37  ;;  %4255 = vst [vmem:[#allocation10_spill] sm:$0xff] %v3633_v11  ;;  %v3639_v24 = vsub.f32 %v290_v63, %v3628_v4  ;;  %v3641_v31 = vand.u32 4294901760, %v296_v13  ;;  %v302_v37 = vsel %vm240_vm1, %v220_v7, 0  ;;  %v521_v49 = vand.u32 4294901760, %v520_v61 }
  0x2e   : > { %2770 = vmatprep.mubr.f32.mxu1 %v491_v57  ;;  %2923 = vmatprep.mubr.f32.mxu0 %v509_v41  ;;  %v531_v52 = vand.u32 4294901760, %v530_v0  ;;  %v540_v53 = vsub.f32 %v3608_v46, %v539_v62  ;;  %v550_v41 = vsub.f32 %v3613_v51, %v549_v1  ;;  %v559_v54 = vand.u32 4294901760, %v3633_v11  ;;  %v224_v0 = vld [vmem:[%s3480_s22 + $0xc0] sm:$0xff] }
  0x2f   : > { %4256 = vst [vmem:[#allocation11_spill] sm:$0xff] %v3639_v24  ;;  %v3651_v56 = vsub.f32 %v293_v5, %v3635_v12  ;;  %v3653_v57 = vand.u32 4294901760, %v299_v32  ;;  %v305_v59 = vsel %vm240_vm1, %v221_v35, 0  ;;  %v569_v60 = vand.u32 4294901760, %v3639_v24 }
  0x30   : > { %v3658_v61 = vsub.f32 %v296_v13, %v3641_v31  ;;  %v3660_v63 = vand.u32 4294901760, %v302_v37  ;;  %v541_v7 = vand.u32 4294901760, %v540_v53  ;;  %v551_v5 = vand.u32 4294901760, %v550_v41 }
  0x31   : > { %2771 = vmatmul.mubr.f32.gmra.mrb[8].mxu1 %v501_v10  ;;  %2924 = vmatmul.mubr.f32.gmra.mrb[10].mxu0 %v519_v45  ;;  %4257 = vst [vmem:[#allocation12_spill] sm:$0xff] %v3651_v56  ;;  %v308_v45 = vsel %vm240_vm1, %v222_v44, 0  ;;  %v3665_v10 = vand.u32 4294901760, %v305_v59  ;;  %v579_v13 = vand.u32 4294901760, %v3651_v56  ;;  %v311_v35 = vsel %vm240_vm1, %v223_v58, 0 }
  0x32   : > { %2773 = vmatprep.mubr.f32.mxu1 %v511_v18  ;;  %2926 = vmatprep.mubr.f32.mxu0 %v529_v50  ;;  %4258 = vst [vmem:[#allocation13_spill] sm:$0xff] %v3658_v61  ;;  %v3667_v51 = vand.u32 4294901760, %v308_v45  ;;  %v560_v50 = vsub.f32 %v3633_v11, %v559_v54  ;;  %v3672_v18 = vsub.f32 %v299_v32, %v3653_v57  ;;  %v589_v53 = vand.u32 4294901760, %v3658_v61 }
  0x33   : > { %v570_v44 = vsub.f32 %v3639_v24, %v569_v60  ;;  %v3678_v41 = vsub.f32 %v302_v37, %v3660_v63  ;;  %v3683_v11 = vsub.f32 %v305_v59, %v3665_v10  ;;  %v3688_v58 = vand.u32 4294901760, %v311_v35 }
  0x34   : > { %4259 = vst [vmem:[#allocation14_spill] sm:$0xff] %v3672_v18  ;;  %v3686_v32 = vsub.f32 %v308_v45, %v3667_v51  ;;  %v580_v37 = vsub.f32 %v3651_v56, %v579_v13  ;;  %v599_v24 = vand.u32 4294901760, %v3672_v18  ;;  %v590_v45 = vsub.f32 %v3658_v61, %v589_v53 }
  0x35   : > { %2774 = vmatmul.mubr.f32.gmra.mrb[10].mxu1 %v521_v49  ;;  %2927 = vmatmul.mubr.f32.gmra.mrb[12].mxu0 %v539_v62  ;;  %4260 = vst [vmem:[#allocation15_spill] sm:$0xff] %v3678_v41  ;;  %v314_v62 = vsel %vm240_vm1, %v224_v0, 0  ;;  %v225_v49 = vld [vmem:[%s3480_s22 + $0xc8] sm:$0xff]  ;;  %4261 = vst [vmem:[#allocation16_spill] sm:$0xff] %v3683_v11  ;;  %v571_v59 = vand.u32 4294901760, %v570_v44  ;;  %v609_v46 = vand.u32 4294901760, %v3678_v41  ;;  %v3703_v33 = vsub.f32 %v311_v35, %v3688_v58 }
  0x36   : > { %2776 = vmatprep.mubr.f32.mxu1 %v531_v52  ;;  %2929 = vmatprep.mubr.f32.mxu0 %v549_v1  ;;  %4262 = vst [vmem:[#allocation17_spill] sm:$0xff] %v3686_v32  ;;  %v226_v1 = vld [vmem:[%s3480_s22 + $0xd0] sm:$0xff]  ;;  %v561_v52 = vand.u32 4294901760, %v560_v50  ;;  %v3693_v0 = vand.u32 4294901760, %v314_v62  ;;  %v317_v42 = vsel %vm240_vm1, %v225_v49, 0  ;;  %v619_v50 = vand.u32 4294901760, %v3683_v11 }
  0x37   : > { %v629_v56 = vand.u32 4294901760, %v3686_v32  ;;  %4263 = vst [vmem:[#allocation18_spill] sm:$0xff] %v3703_v33  ;;  %v600_v44 = vsub.f32 %v3672_v18, %v599_v24  ;;  %v591_v61 = vand.u32 4294901760, %v590_v45  ;;  %v610_v21 = vsub.f32 %v3678_v41, %v609_v46 }
  0x38   : > { %v3708_v49 = vsub.f32 %v314_v62, %v3693_v0  ;;  %v639_v18 = vand.u32 4294901760, %v3703_v33 }
  0x39   : > { %2777 = vmatmul.mubr.f32.gmra.mrb[12].mxu1 %v541_v7  ;;  %2930 = vmatmul.mubr.f32.gmra.mrb[14].mxu0 %v559_v54  ;;  %v320_v7 = vsel %vm240_vm1, %v226_v1, 0  ;;  %v227_v54 = vld [vmem:[%s3480_s22 + $0xd8] sm:$0xff]  ;;  %v3710_v1 = vand.u32 4294901760, %v317_v42  ;;  %v630_v62 = vsub.f32 %v3686_v32, %v629_v56 }
  0x3a   : > { %2779 = vmatprep.mubr.f32.mxu1 %v551_v5  ;;  %2932 = vmatprep.mubr.f32.mxu0 %v569_v60  ;;  %v228_v5 = vld [vmem:[%s3480_s22 + $0xe0] sm:$0xff]  ;;  %v581_v60 = vand.u32 4294901760, %v580_v37  ;;  %4264 = vst [vmem:[#allocation19_spill] sm:$0xff] %v3708_v49  ;;  %v3713_v20 = vand.u32 4294901760, %v320_v7  ;;  %v323_v35 = vsel %vm240_vm1, %v227_v54, 0  ;;  %v620_v37 = vsub.f32 %v3683_v11, %v619_v50 }
  0x3b   : > { %v3724_v45 = vsub.f32 %v317_v42, %v3710_v1  ;;  %v3726_v54 = vand.u32 4294901760, %v323_v35  ;;  %v631_v48 = vand.u32 4294901760, %v630_v62  ;;  %v640_v42 = vsub.f32 %v3703_v33, %v639_v18 }
  0x3c   : > { %v3729_v11 = vsub.f32 %v320_v7, %v3713_v20 }
  0x3d   : > { %2780 = vmatmul.mubr.f32.gmra.mrb[14].mxu1 %v561_v52  ;;  %2933 = vmatmul.mubr.f32.gmra.mrb[16].mxu0 %v579_v13  ;;  %v326_v13 = vsel %vm240_vm1, %v228_v5, 0  ;;  %v229_v52 = vld [vmem:[%s3480_s22 + $0xe8] sm:$0xff]  ;;  %v611_v5 = vand.u32 4294901760, %v610_v21  ;;  %v641_v62 = vand.u32 4294901760, %v640_v42 }
  0x3e   : > { %2782 = vmatprep.mubr.f32.mxu1 %v571_v59  ;;  %2935 = vmatprep.mubr.f32.mxu0 %v589_v53  ;;  %v601_v53 = vand.u32 4294901760, %v600_v44  ;;  %v649_v59 = vand.u32 4294901760, %v3708_v49  ;;  %v3731_v41 = vand.u32 4294901760, %v326_v13  ;;  %v329_v32 = vsel %vm240_vm1, %v229_v52, 0 }
  0x3f   : > { %v621_v44 = vand.u32 4294901760, %v620_v37  ;;  %v3742_v7 = vand.u32 4294901760, %v329_v32 }
  0x40   : > { %v650_v21 = vsub.f32 %v3708_v49, %v649_v59  ;;  %v3746_v52 = vsub.f32 %v326_v13, %v3731_v41 }
  0x41   : > { %2783 = vmatmul.mubr.f32.gmra.mrb[16].mxu1 %v581_v60  ;;  %2936 = vmatmul.mubr.f32.gmra.mrb[18].mxu0 %v599_v24  ;;  %v332_v24 = vsel %vm240_vm1, %v230_v14, 0  ;;  %v231_v60 = vld [vmem:[%s3480_s22 + $0xf8] sm:$0xff]  ;;  %v669_v14 = vand.u32 4294901760, %v3729_v11  ;;  %v3754_v49 = vsub.f32 %v329_v32, %v3742_v7 }
  0x42   : > { %2785 = vmatprep.mubr.f32.mxu1 %v591_v61  ;;  %2938 = vmatprep.mubr.f32.mxu0 %v609_v46  ;;  %v659_v61 = vand.u32 4294901760, %v3724_v45  ;;  %v3740_v46 = vsub.f32 %v323_v35, %v3726_v54  ;;  %v3748_v37 = vand.u32 4294901760, %v332_v24  ;;  %v651_v13 = vand.u32 4294901760, %v650_v21 }
  0x43   : > { %v689_v33 = vand.u32 4294901760, %v3746_v52  ;;  %v699_v32 = vand.u32 4294901760, %v3754_v49 }
  0x44   : > { %v679_v35 = vand.u32 4294901760, %v3740_v46 }
  0x45   : > { %2786 = vmatmul.mubr.f32.gmra.mrb[18].mxu1 %v601_v53  ;;  %2939 = vmatmul.mubr.f32.gmra.mrb[20].mxu0 %v619_v50  ;;  %v335_v50 = vsel %vm240_vm1, %v231_v60, 0  ;;  %v660_v53 = vsub.f32 %v3724_v45, %v659_v61  ;;  %v3761_v60 = vsub.f32 %v332_v24, %v3748_v37 }
  0x46   : > { %2788 = vmatprep.mubr.f32.mxu1 %v611_v5  ;;  %2941 = vmatprep.mubr.f32.mxu0 %v629_v56  ;;  %v3756_v56 = vand.u32 4294901760, %v335_v50  ;;  %v670_v5 = vsub.f32 %v3729_v11, %v669_v14 }
  0x47   : > { %v709_v21 = vand.u32 4294901760, %v3761_v60 }
  0x48   : > { %v3766_v42 = vsub.f32 %v335_v50, %v3756_v56 }
  0x49   : > { %2789 = vmatmul.mubr.f32.gmra.mrb[20].mxu1 %v621_v44  ;;  %2942 = vmatmul.mubr.f32.gmra.mrb[22].mxu0 %v639_v18  ;;  %v661_v18 = vand.u32 4294901760, %v660_v53  ;;  %v680_v44 = vsub.f32 %v3740_v46, %v679_v35  ;;  %v710_v50 = vsub.f32 %v3761_v60, %v709_v21 }
  0x4a   : > { %2791 = vmatprep.mubr.f32.mxu1 %v631_v48  ;;  %2944 = vmatprep.mubr.f32.mxu0 %v649_v59  ;;  %v671_v48 = vand.u32 4294901760, %v670_v5  ;;  %v690_v59 = vsub.f32 %v3746_v52, %v689_v33 }
  0x4b   : > { %v681_v24 = vand.u32 4294901760, %v680_v44  ;;  %v711_v5 = vand.u32 4294901760, %v710_v50 }
  0x4c   : > { %v691_v53 = vand.u32 4294901760, %v690_v59 }
  0x4d   : > { %2792 = vmatmul.mubr.f32.gmra.mrb[22].mxu1 %v641_v62  ;;  %2945 = vmatmul.mubr.f32.gmra.mrb[24].mxu0 %v659_v61  ;;  %v700_v61 = vsub.f32 %v3754_v49, %v699_v32  ;;  %v719_v62 = vand.u32 4294901760, %v3766_v42 }
  0x4e   : > { %2794 = vmatprep.mubr.f32.mxu1 %v651_v13  ;;  %2947 = vmatprep.mubr.f32.mxu0 %v669_v14 }
  0x4f   : > { %v701_v14 = vand.u32 4294901760, %v700_v61  ;;  %v720_v13 = vsub.f32 %v3766_v42, %v719_v62 }
  0x51   : > { %2795 = vmatmul.mubr.f32.gmra.mrb[24].mxu1 %v661_v18  ;;  %2948 = vmatmul.mubr.f32.gmra.mrb[26].mxu0 %v679_v35  ;;  %v721_v35 = vand.u32 4294901760, %v720_v13 }
  0x52   : > { %2797 = vmatprep.mubr.f32.mxu1 %v671_v48  ;;  %2950 = vmatprep.mubr.f32.mxu0 %v689_v33 }
  0x55   : > { %2798 = vmatmul.mubr.f32.gmra.mrb[26].mxu1 %v681_v24  ;;  %2951 = vmatmul.mubr.f32.gmra.mrb[28].mxu0 %v699_v32 }
  0x56   : > { %2800 = vmatprep.mubr.f32.mxu1 %v691_v53  ;;  %2953 = vmatprep.mubr.f32.mxu0 %v709_v21 }
  0x59   : > { %2801 = vmatmul.mubr.f32.gmra.mrb[28].mxu1 %v701_v14  ;;  %2954 = vmatmul.mubr.f32.gmra.mrb[30].mxu0 %v719_v62 }
  0x5a   : > { %2803 = vmatprep.mubr.f32.mxu1 %v711_v5  ;;  %2958 = vmatprep.mubr.f32.mxu0 %v3493_v15 }
  0x5d   : > { %2804 = vmatmul.mubr.f32.gmra.mrb[30].mxu1 %v721_v35  ;;  %2959 = vmatmul.mubr.f32.vlgmr.msra.gmra.mrb[0].mxu0 %v3495_v16 }
  0x5e   : > { %2808 = vmatprep.mubr.f32.mxu1 %v3493_v15  ;;  %2961 = vmatprep.mubr.f32.mxu0 %v3497_v17 }
  0x5f   : > { %3007 = vmatpush3.msra.mxu0 %v3468_v2  ;;  %v4265_v2 = vld [vmem:[#allocation2_spill] sm:$0xff] }
  0x61   : > { %2809 = vmatmul.mubr.f32.vlgmr.msra.gmra.mrb[0].mxu1 %v3495_v16  ;;  %2962 = vmatmul.mubr.f32.gmra.mrb[2].mxu0 %v3502_v22 }
  0x62   : > { %2857 = vmatpush3.msra.mxu1 %v3473_v3  ;;  %2811 = vmatprep.mubr.f32.mxu1 %v3497_v17  ;;  %v4266_v3 = vld [vmem:[#allocation3_spill] sm:$0xff] }
  0x63   : > { %2964 = vmatprep.mubr.f32.mxu0 %v3515_v28 }
  0x65   : > { %2812 = vmatmul.mubr.f32.gmra.mrb[2].mxu1 %v3502_v22  ;;  %2965 = vmatmul.mubr.f32.gmra.mrb[4].mxu0 %v3520_v30 }
  0x66   : > { %2814 = vmatprep.mubr.f32.mxu1 %v3515_v28  ;;  %2967 = vmatprep.mubr.f32.mxu0 %v3534_v39 }
  0x69   : > { %2815 = vmatmul.mubr.f32.gmra.mrb[4].mxu1 %v3520_v30  ;;  %2968 = vmatmul.mubr.f32.gmra.mrb[6].mxu0 %v3536_v40 }
  0x6a   : > { %2817 = vmatprep.mubr.f32.mxu1 %v3534_v39  ;;  %2970 = vmatprep.mubr.f32.mxu0 %v3564_v6 }
  0x6d   : > { %2818 = vmatmul.mubr.f32.gmra.mrb[6].mxu1 %v3536_v40  ;;  %2971 = vmatmul.mubr.f32.gmra.mrb[8].mxu0 %v3567_v8 }
  0x6e   : > { %2820 = vmatprep.mubr.f32.mxu1 %v3564_v6  ;;  %2973 = vmatprep.mubr.f32.mxu0 %v3569_v9 }
  0x71   : > { %2821 = vmatmul.mubr.f32.gmra.mrb[8].mxu1 %v3567_v8  ;;  %2974 = vmatmul.mubr.f32.gmra.mrb[10].mxu0 %v3578_v19 }
  0x72   : > { %2823 = vmatprep.mubr.f32.mxu1 %v3569_v9  ;;  %2976 = vmatprep.mubr.f32.mxu0 %v3587_v23 }
  0x75   : > { %2824 = vmatmul.mubr.f32.gmra.mrb[10].mxu1 %v3578_v19  ;;  %2977 = vmatmul.mubr.f32.gmra.mrb[12].mxu0 %v3595_v34 }
  0x76   : > { %2826 = vmatprep.mubr.f32.mxu1 %v3587_v23  ;;  %2979 = vmatprep.mubr.f32.mxu0 %v3603_v43 }
  0x79   : > { %2827 = vmatmul.mubr.f32.gmra.mrb[12].mxu1 %v3595_v34  ;;  %2980 = vmatmul.mubr.f32.gmra.mrb[14].mxu0 %v3617_v55 }
  0x7a   : > { %2829 = vmatprep.mubr.f32.mxu1 %v3603_v43  ;;  %2982 = vmatprep.mubr.f32.mxu0 %v3628_v4 }
  0x7d   : > { %2830 = vmatmul.mubr.f32.gmra.mrb[14].mxu1 %v3617_v55  ;;  %2983 = vmatmul.mubr.f32.gmra.mrb[16].mxu0 %v3635_v12 }
  0x7e   : > { %2832 = vmatprep.mubr.f32.mxu1 %v3628_v4  ;;  %2985 = vmatprep.mubr.f32.mxu0 %v3641_v31 }
  0x81   : > { %2833 = vmatmul.mubr.f32.gmra.mrb[16].mxu1 %v3635_v12  ;;  %2986 = vmatmul.mubr.f32.gmra.mrb[18].mxu0 %v3653_v57 }
  0x82   : > { %2835 = vmatprep.mubr.f32.mxu1 %v3641_v31  ;;  %2988 = vmatprep.mubr.f32.mxu0 %v3660_v63 }
  0x85   : > { %2836 = vmatmul.mubr.f32.gmra.mrb[18].mxu1 %v3653_v57  ;;  %2989 = vmatmul.mubr.f32.gmra.mrb[20].mxu0 %v3665_v10 }
  0x86   : > { %2838 = vmatprep.mubr.f32.mxu1 %v3660_v63  ;;  %2991 = vmatprep.mubr.f32.mxu0 %v3667_v51 }
  0x89   : > { %2839 = vmatmul.mubr.f32.gmra.mrb[20].mxu1 %v3665_v10  ;;  %2992 = vmatmul.mubr.f32.gmra.mrb[22].mxu0 %v3688_v58 }
  0x8a   : > { %2841 = vmatprep.mubr.f32.mxu1 %v3667_v51  ;;  %2994 = vmatprep.mubr.f32.mxu0 %v3693_v0 }
  0x8d   : > { %2842 = vmatmul.mubr.f32.gmra.mrb[22].mxu1 %v3688_v58  ;;  %2995 = vmatmul.mubr.f32.gmra.mrb[24].mxu0 %v3710_v1 }
  0x8e   : > { %2844 = vmatprep.mubr.f32.mxu1 %v3693_v0  ;;  %2997 = vmatprep.mubr.f32.mxu0 %v3713_v20 }
  0x91   : > { %2845 = vmatmul.mubr.f32.gmra.mrb[24].mxu1 %v3710_v1  ;;  %2998 = vmatmul.mubr.f32.gmra.mrb[26].mxu0 %v3726_v54 }
  0x92   : > { %2847 = vmatprep.mubr.f32.mxu1 %v3713_v20  ;;  %3000 = vmatprep.mubr.f32.mxu0 %v3731_v41 }
  0x95   : > { %2848 = vmatmul.mubr.f32.gmra.mrb[26].mxu1 %v3726_v54  ;;  %3001 = vmatmul.mubr.f32.gmra.mrb[28].mxu0 %v3742_v7 }
  0x96   : > { %2850 = vmatprep.mubr.f32.mxu1 %v3731_v41  ;;  %3003 = vmatprep.mubr.f32.mxu0 %v3748_v37 }
  0x99   : > { %2851 = vmatmul.mubr.f32.gmra.mrb[28].mxu1 %v3742_v7  ;;  %3004 = vmatmul.mubr.f32.gmra.mrb[30].mxu0 %v3756_v56 }
  0x9a   : > { %2853 = vmatprep.mubr.f32.mxu1 %v3748_v37  ;;  %3008 = vmatprep.mubr.f32.mxu0 %v3493_v15  ;;  %v4267_v15 = vld [vmem:[#allocation4_spill] sm:$0xff] }
  0x9d   : > { %2854 = vmatmul.mubr.f32.gmra.mrb[30].mxu1 %v3756_v56  ;;  %3009 = vmatmul.mubr.f32.vlgmr.msra.gmra.mrb[0].mxu0 %v3495_v16  ;;  %v4268_v16 = vld [vmem:[#allocation5_spill] sm:$0xff] }
  0x9e   : > { %2858 = vmatprep.mubr.f32.mxu1 %v3507_v25  ;;  %3011 = vmatprep.mubr.f32.mxu0 %v3497_v17  ;;  %v4269_v17 = vld [vmem:[#allocation6_spill] sm:$0xff]  ;;  %v4271_v25 = vld [vmem:[#allocation8_spill] sm:$0xff] }
  0xa1   : > { %2859 = vmatmul.mubr.f32.vlgmr.msra.gmra.mrb[0].mxu1 %v3510_v26  ;;  %3012 = vmatmul.mubr.f32.gmra.mrb[2].mxu0 %v3502_v22  ;;  %v4270_v22 = vld [vmem:[#allocation7_spill] sm:$0xff]  ;;  %v4272_v26 = vld [vmem:[#allocation9_spill] sm:$0xff] }
  0xa2   : > { %2861 = vmatprep.mubr.f32.mxu1 %v3513_v27  ;;  %3014 = vmatprep.mubr.f32.mxu0 %v3515_v28  ;;  %v4273_v27 = vld [vmem:[#allocation10_spill] sm:$0xff]  ;;  %v4274_v28 = vld [vmem:[#allocation11_spill] sm:$0xff] }
  0xa5   : > { %2862 = vmatmul.mubr.f32.gmra.mrb[2].mxu1 %v3518_v29  ;;  %3015 = vmatmul.mubr.f32.gmra.mrb[4].mxu0 %v3520_v30  ;;  %v4275_v29 = vld [vmem:[#allocation12_spill] sm:$0xff]  ;;  %v4276_v30 = vld [vmem:[#allocation13_spill] sm:$0xff] }
  0xa6   : > { %2864 = vmatprep.mubr.f32.mxu1 %v3528_v36  ;;  %3017 = vmatprep.mubr.f32.mxu0 %v3534_v39  ;;  %v4277_v36 = vld [vmem:[#allocation14_spill] sm:$0xff]  ;;  %v4279_v39 = vld [vmem:[#allocation16_spill] sm:$0xff] }
  0xa9   : > { %2865 = vmatmul.mubr.f32.gmra.mrb[4].mxu1 %v3532_v38  ;;  %3018 = vmatmul.mubr.f32.gmra.mrb[6].mxu0 %v3536_v40  ;;  %v4278_v38 = vld [vmem:[#allocation15_spill] sm:$0xff]  ;;  %v4280_v40 = vld [vmem:[#allocation17_spill] sm:$0xff] }
  0xaa   : > { %2867 = vmatprep.mubr.f32.mxu1 %v3545_v47  ;;  %3020 = vmatprep.mubr.f32.mxu0 %v3564_v6  ;;  %v4281_v47 = vld [vmem:[#allocation18_spill] sm:$0xff]  ;;  %v4282_v6 = vld [vmem:[#allocation19_spill] sm:$0xff] }
  0xad   : > { %2868 = vmatmul.mubr.f32.gmra.mrb[6].mxu1 %v4265_v2  ;;  %3021 = vmatmul.mubr.f32.gmra.mrb[8].mxu0 %v3567_v8 }
  0xae   : > { %2870 = vmatprep.mubr.f32.mxu1 %v4266_v3  ;;  %3023 = vmatprep.mubr.f32.mxu0 %v3569_v9 }
  0xb1   : > { %2871 = vmatmul.mubr.f32.gmra.mrb[8].mxu1 %v4267_v15  ;;  %3024 = vmatmul.mubr.f32.gmra.mrb[10].mxu0 %v3578_v19  ;;  %v3907_v19 = vld [vmem:[%s4227_s2] ss:$0 sm:$0xff] }
  0xb2   : > { %2873 = vmatprep.mubr.f32.mxu1 %v4268_v16  ;;  %3026 = vmatprep.mubr.f32.mxu0 %v3587_v23 }
  0xb5   : > { %2874 = vmatmul.mubr.f32.gmra.mrb[10].mxu1 %v4269_v17  ;;  %3027 = vmatmul.mubr.f32.gmra.mrb[12].mxu0 %v3595_v34 }
  0xb6   : > { %2876 = vmatprep.mubr.f32.mxu1 %v4270_v22  ;;  %3029 = vmatprep.mubr.f32.mxu0 %v3603_v43 }
  0xb9   : > { %2877 = vmatmul.mubr.f32.gmra.mrb[12].mxu1 %v4271_v25  ;;  %3030 = vmatmul.mubr.f32.gmra.mrb[14].mxu0 %v3617_v55 }
  0xba   : > { %2879 = vmatprep.mubr.f32.mxu1 %v4272_v26  ;;  %3032 = vmatprep.mubr.f32.mxu0 %v3628_v4 }
  0xbd   : > { %2880 = vmatmul.mubr.f32.gmra.mrb[14].mxu1 %v4273_v27  ;;  %3033 = vmatmul.mubr.f32.gmra.mrb[16].mxu0 %v3635_v12 }
  0xbe   : > { %2882 = vmatprep.mubr.f32.mxu1 %v4274_v28  ;;  %3035 = vmatprep.mubr.f32.mxu0 %v3641_v31 }
  0xc1   : > { %2883 = vmatmul.mubr.f32.gmra.mrb[16].mxu1 %v4275_v29  ;;  %3036 = vmatmul.mubr.f32.gmra.mrb[18].mxu0 %v3653_v57 }
  0xc2   : > { %2885 = vmatprep.mubr.f32.mxu1 %v4276_v30  ;;  %3038 = vmatprep.mubr.f32.mxu0 %v3660_v63 }
  0xc5   : > { %2886 = vmatmul.mubr.f32.gmra.mrb[18].mxu1 %v4277_v36  ;;  %3039 = vmatmul.mubr.f32.gmra.mrb[20].mxu0 %v3665_v10 }
  0xc6   : > { %2888 = vmatprep.mubr.f32.mxu1 %v4278_v38  ;;  %3041 = vmatprep.mubr.f32.mxu0 %v3667_v51 }
  0xc9   : > { %2889 = vmatmul.mubr.f32.gmra.mrb[20].mxu1 %v4279_v39  ;;  %3042 = vmatmul.mubr.f32.gmra.mrb[22].mxu0 %v3688_v58 }
  0xca   : > { %2891 = vmatprep.mubr.f32.mxu1 %v4280_v40  ;;  %3044 = vmatprep.mubr.f32.mxu0 %v3693_v0 }
  0xcd   : > { %2892 = vmatmul.mubr.f32.gmra.mrb[22].mxu1 %v4281_v47  ;;  %3045 = vmatmul.mubr.f32.gmra.mrb[24].mxu0 %v3710_v1 }
  0xce   : > { %2894 = vmatprep.mubr.f32.mxu1 %v4282_v6  ;;  %3047 = vmatprep.mubr.f32.mxu0 %v3713_v20 }
  0xd1   : > { %2895 = vmatmul.mubr.f32.gmra.mrb[24].mxu1 %v3724_v45  ;;  %3048 = vmatmul.mubr.f32.gmra.mrb[26].mxu0 %v3726_v54 }
  0xd2   : > { %2897 = vmatprep.mubr.f32.mxu1 %v3729_v11  ;;  %3050 = vmatprep.mubr.f32.mxu0 %v3731_v41 }
  0xd5   : > { %2898 = vmatmul.mubr.f32.gmra.mrb[26].mxu1 %v3740_v46  ;;  %3051 = vmatmul.mubr.f32.gmra.mrb[28].mxu0 %v3742_v7 }
  0xd6   : > { %2900 = vmatprep.mubr.f32.mxu1 %v3746_v52  ;;  %3053 = vmatprep.mubr.f32.mxu0 %v3748_v37 }
  0xd9   : > { %2901 = vmatmul.mubr.f32.gmra.mrb[28].mxu1 %v3754_v49  ;;  %3054 = vmatmul.mubr.f32.gmra.mrb[30].mxu0 %v3756_v56 }
  0xda   : > { %2903 = vmatprep.mubr.f32.mxu1 %v3761_v60 }
  0xdd   : > { %2904 = vmatmul.mubr.f32.gmra.mrb[30].mxu1 %v3766_v42 }
 0x170   : > { %v3010_v8 = vpop.f32.mrb[0].mxu0 }
 0x171   : > { %v1930_v9 = vpop.f32.mrb[1].mxu0 }
 0x174   : > { %v2860_v20 = vpop.f32.mrb[0].mxu1  ;;  %v3013_v23 = vpop.f32.mrb[2].mxu0 }
 0x175   : > { %v3056_v33 = vadd.f32 %v2860_v20, %v3907_v19  ;;  %v1059_v34 = vpop.f32.mrb[1].mxu1  ;;  %v1942_v43 = vpop.f32.mrb[3].mxu0 }
 0x176   : > { %v3058_v51 = vadd.f32 %v3907_v19, %v1059_v34 }
 0x177   : > { %v3911_v55 = vadd.f32 %v3056_v33, %v3010_v8 }
 0x178   : > { %v3913_v4 = vadd.f32 %v3058_v51, %v1930_v9  ;;  %v2863_v11 = vpop.f32.mrb[2].mxu1  ;;  %v3016_v12 = vpop.f32.mrb[4].mxu0 }
 0x179   : > { %v2492_v31 = vmul.f32 -1.442695, %v3911_v55  ;;  %v3060_v57 = vadd.f32 %v2863_v11, %v3907_v19  ;;  %v1073_v63 = vpop.f32.mrb[3].mxu1  ;;  %v1954_v10 = vpop.f32.mrb[5].mxu0 }
 0x17a   : > { %v2491_v41 = vmul.f32 -1.442695, %v3913_v4  ;;  %v3062_v58 = vadd.f32 %v3907_v19, %v1073_v63 }
 0x17b   : > { %3272 = vpow2.f32 %v2492_v31  ;;  %v3919_v0 = vadd.f32 %v3060_v57, %v3013_v23 }
 0x17c   : > { %3274 = vpow2.f32 %v2491_v41  ;;  %v3921_v49 = vadd.f32 %v3062_v58, %v1942_v43  ;;  %v2866_v1 = vpop.f32.mrb[4].mxu1  ;;  %v3019_v45 = vpop.f32.mrb[6].mxu0 }
 0x17d   : > { %v2494_v54 = vmul.f32 -1.442695, %v3919_v0  ;;  %v3064_v46 = vadd.f32 %v2866_v1, %v3907_v19  ;;  %v1087_v7 = vpop.f32.mrb[5].mxu1  ;;  %v1966_v52 = vpop.f32.mrb[7].mxu0 }
 0x17e   : > { %v2493_v37 = vmul.f32 -1.442695, %v3921_v49  ;;  %v3066_v56 = vadd.f32 %v3907_v19, %v1087_v7 }
 0x17f   : > { %3276 = vpow2.f32 %v2494_v54  ;;  %v3927_v60 = vadd.f32 %v3064_v46, %v3016_v12 }
 0x180   : > { %3278 = vpow2.f32 %v2493_v37  ;;  %v3929_v18 = vadd.f32 %v3066_v56, %v1954_v10  ;;  %v2869_v44 = vpop.f32.mrb[6].mxu1  ;;  %v3022_v32 = vpop.f32.mrb[8].mxu0 }
 0x181   : > { %v2496_v42 = vmul.f32 -1.442695, %v3927_v60  ;;  %v3068_v48 = vadd.f32 %v2869_v44, %v3907_v19  ;;  %v1101_v59 = vpop.f32.mrb[7].mxu1  ;;  %v1978_v21 = vpop.f32.mrb[9].mxu0 }
 0x182   : > { %v2495_v24 = vmul.f32 -1.442695, %v3929_v18  ;;  %v3070_v61 = vadd.f32 %v3907_v19, %v1101_v59 }
 0x183   : > { %3280 = vpow2.f32 %v2496_v42  ;;  %v3935_v62 = vadd.f32 %v3068_v48, %v3019_v45 }
 0x184   : > { %3282 = vpow2.f32 %v2495_v24  ;;  %v3938_v53 = vadd.f32 %v3070_v61, %v1966_v52  ;;  %v2872_v50 = vpop.f32.mrb[8].mxu1  ;;  %v3025_v14 = vpop.f32.mrb[10].mxu0 }
 0x185   : > { %v3273_v13 = vpop.eup %3272  ;;  %v2498_v5 = vmul.f32 -1.442695, %v3935_v62  ;;  %v3072_v35 = vadd.f32 %v2872_v50, %v3907_v19  ;;  %v1115_v2 = vpop.f32.mrb[9].mxu1 }
 0x186   : > { %v1990_v3 = vpop.f32.mrb[11].mxu0  ;;  %v3275_v15 = vpop.eup %3274  ;;  %v2217_v16 = vadd.f32 1.0, %v3273_v13  ;;  %v2497_v17 = vmul.f32 -1.442695, %v3938_v53  ;;  %v3074_v22 = vadd.f32 %v3907_v19, %v1115_v2 }
 0x187   : > { %v2216_v25 = vadd.f32 1.0, %v3275_v15  ;;  %3284 = vpow2.f32 %v2498_v5  ;;  %v3950_v26 = vadd.f32 %v3072_v35, %v3022_v32 }
 0x188   : > { %3286 = vrcp.f32 %v2217_v16  ;;  %v3952_v27 = vadd.f32 %v3074_v22, %v1978_v21  ;;  %v2875_v28 = vpop.f32.mrb[10].mxu1  ;;  %v3028_v29 = vpop.f32.mrb[12].mxu0 }
 0x189   : > { %v3277_v30 = vpop.eup %3276  ;;  %3288 = vrcp.f32 %v2216_v25  ;;  %v2500_v36 = vmul.f32 -1.442695, %v3950_v26  ;;  %v3076_v38 = vadd.f32 %v2875_v28, %v3907_v19  ;;  %v1129_v39 = vpop.f32.mrb[11].mxu1 }
 0x18a   : > { %v2002_v40 = vpop.f32.mrb[13].mxu0  ;;  %v3279_v47 = vpop.eup %3278  ;;  %v2219_v6 = vadd.f32 1.0, %v3277_v30  ;;  %3290 = vpow2.f32 %v2497_v17  ;;  %v2499_v8 = vmul.f32 -1.442695, %v3952_v27  ;;  %v3078_v9 = vadd.f32 %v3907_v19, %v1129_v39 }
 0x18b   : > { %v2218_v20 = vadd.f32 1.0, %v3279_v47  ;;  %3292 = vpow2.f32 %v2500_v36  ;;  %v3964_v23 = vadd.f32 %v3076_v38, %v3025_v14 }
 0x18c   : > { %3294 = vrcp.f32 %v2219_v6  ;;  %v3966_v33 = vadd.f32 %v3078_v9, %v1990_v3  ;;  %v2878_v34 = vpop.f32.mrb[12].mxu1  ;;  %v3031_v43 = vpop.f32.mrb[14].mxu0 }
 0x18d   : > { %v3281_v51 = vpop.eup %3280  ;;  %3296 = vrcp.f32 %v2218_v20  ;;  %v2502_v11 = vmul.f32 -1.442695, %v3964_v23  ;;  %v3080_v12 = vadd.f32 %v2878_v34, %v3907_v19  ;;  %v1143_v31 = vpop.f32.mrb[13].mxu1 }
 0x18e   : > { %v2014_v57 = vpop.f32.mrb[15].mxu0  ;;  %v3283_v63 = vpop.eup %3282  ;;  %v2221_v10 = vadd.f32 1.0, %v3281_v51  ;;  %3298 = vpow2.f32 %v2499_v8  ;;  %v2501_v41 = vmul.f32 -1.442695, %v3966_v33  ;;  %v3082_v58 = vadd.f32 %v3907_v19, %v1143_v31 }
 0x18f   : > { %v2220_v1 = vadd.f32 1.0, %v3283_v63  ;;  %3300 = vpow2.f32 %v2502_v11  ;;  %v3973_v45 = vadd.f32 %v3080_v12, %v3028_v29 }
 0x190   : > { %3302 = vrcp.f32 %v2221_v10  ;;  %v3975_v54 = vadd.f32 %v3082_v58, %v2002_v40  ;;  %v2881_v46 = vpop.f32.mrb[14].mxu1  ;;  %v3034_v7 = vpop.f32.mrb[16].mxu0 }
 0x191   : > { %v3285_v52 = vpop.eup %3284  ;;  %3304 = vrcp.f32 %v2220_v1  ;;  %v2504_v37 = vmul.f32 -1.442695, %v3973_v45  ;;  %v3084_v56 = vadd.f32 %v2881_v46, %v3907_v19  ;;  %v1157_v44 = vpop.f32.mrb[15].mxu1 }
 0x192   : > { %v2026_v32 = vpop.f32.mrb[17].mxu0  ;;  %v3287_v42 = vpop.eup %3286  ;;  %v2223_v48 = vadd.f32 1.0, %v3285_v52  ;;  %3306 = vpow2.f32 %v2501_v41  ;;  %v2503_v59 = vmul.f32 -1.442695, %v3975_v54  ;;  %v3086_v21 = vadd.f32 %v3907_v19, %v1157_v44 }
 0x193   : > { %v3289_v24 = vpop.eup %3288  ;;  %v2313_v61 = vmul.f32 %v3287_v42, %v3911_v55  ;;  %3308 = vpow2.f32 %v2504_v37  ;;  %v3987_v50 = vadd.f32 %v3084_v56, %v3031_v43 }
 0x194   : > { %v3291_v14 = vpop.eup %3290  ;;  %v2312_v13 = vmul.f32 %v3289_v24, %v3913_v4  ;;  %3310 = vrcp.f32 %v2223_v48  ;;  %v3990_v5 = vadd.f32 %v3086_v21, %v2014_v57  ;;  %v2884_v35 = vpop.f32.mrb[16].mxu1 }
 0x195   : > { %v3037_v2 = vpop.f32.mrb[18].mxu0  ;;  %v3293_v3 = vpop.eup %3292  ;;  %2346 = vst.msk [vmem:[%s3982_s30 + $0x8] sm:$0xff] %vm2344_vm2, %v2313_v61  ;;  %2524 = vst.msk [vmem:[%s3982_s30 + $0x18] sm:$0xff] %vm2344_vm2, %v2313_v61  ;;  %v2222_v15 = vadd.f32 1.0, %v3291_v14  ;;  %3312 = vpow2.f32 %v2503_v59  ;;  %v2506_v55 = vmul.f32 -1.442695, %v3987_v50  ;;  %v3088_v16 = vadd.f32 %v2884_v35, %v3907_v19 }
 0x196   : > { %v1171_v17 = vpop.f32.mrb[17].mxu1  ;;  %v2038_v22 = vpop.f32.mrb[19].mxu0  ;;  %2345 = vst.msk [vmem:[%s3982_s30] sm:$0xff] %vm2344_vm2, %v2312_v13  ;;  %2523 = vst.msk [vmem:[%s3982_s30 + $0x10] sm:$0xff] %vm2344_vm2, %v2312_v13  ;;  %v2225_v25 = vadd.f32 1.0, %v3293_v3 }
 0x197   : > { %v3295_v4 = vpop.eup %3294  ;;  %v2505_v28 = vmul.f32 -1.442695, %v3990_v5  ;;  %v3090_v29 = vadd.f32 %v3907_v19, %v1171_v17  ;;  %3314 = vrcp.f32 %v2222_v15  ;;  %v4005_v38 = vadd.f32 %v3088_v16, %v3034_v7 }
 0x198   : > { %v3297_v30 = vpop.eup %3296  ;;  %v2315_v36 = vmul.f32 %v3295_v4, %v3919_v0  ;;  %3316 = vrcp.f32 %v2225_v25  ;;  %v2887_v6 = vpop.f32.mrb[18].mxu1 }
 0x199   : > { %v3299_v39 = vpop.eup %3298  ;;  %v2314_v40 = vmul.f32 %v3297_v30, %v3921_v49  ;;  %v4008_v47 = vadd.f32 %v3090_v29, %v2026_v32  ;;  %v3040_v8 = vpop.f32.mrb[20].mxu0  ;;  %3318 = vpow2.f32 %v2506_v55  ;;  %v2508_v0 = vmul.f32 -1.442695, %v4005_v38 }
 0x19a   : > { %v3301_v9 = vpop.eup %3300  ;;  %2348 = vst.msk [vmem:[%s3982_s30 + $0x28] sm:$0xff] %vm2344_vm2, %v2315_v36  ;;  %2526 = vst.msk [vmem:[%s3982_s30 + $0x38] sm:$0xff] %vm2344_vm2, %v2315_v36  ;;  %v2224_v20 = vadd.f32 1.0, %v3299_v39  ;;  %v3092_v34 = vadd.f32 %v2887_v6, %v3907_v19  ;;  %v1185_v43 = vpop.f32.mrb[19].mxu1  ;;  %3320 = vpow2.f32 %v2505_v28 }
 0x19b   : > { %v2050_v51 = vpop.f32.mrb[21].mxu0  ;;  %v3303_v49 = vpop.eup %3302  ;;  %2347 = vst.msk [vmem:[%s3982_s30 + $0x20] sm:$0xff] %vm2344_vm2, %v2314_v40  ;;  %2525 = vst.msk [vmem:[%s3982_s30 + $0x30] sm:$0xff] %vm2344_vm2, %v2314_v40  ;;  %v2227_v11 = vadd.f32 1.0, %v3301_v9  ;;  %v2507_v12 = vmul.f32 -1.442695, %v4008_v47  ;;  %v3094_v31 = vadd.f32 %v3907_v19, %v1185_v43 }
 0x19c   : > { %v3305_v57 = vpop.eup %3304  ;;  %v2317_v63 = vmul.f32 %v3303_v49, %v3927_v60  ;;  %3322 = vrcp.f32 %v2224_v20  ;;  %v4023_v10 = vadd.f32 %v3092_v34, %v3037_v2  ;;  %v2890_v46 = vpop.f32.mrb[20].mxu1 }
 0x19d   : > { %v3307_v41 = vpop.eup %3306  ;;  %v2316_v58 = vmul.f32 %v3305_v57, %v3929_v18  ;;  %3324 = vrcp.f32 %v2227_v11  ;;  %v4026_v1 = vadd.f32 %v3094_v31, %v2038_v22  ;;  %v3043_v7 = vpop.f32.mrb[22].mxu0  ;;  %v3096_v56 = vadd.f32 %v2890_v46, %v3907_v19 }
 0x19e   : > { %v3309_v52 = vpop.eup %3308  ;;  %2350 = vst.msk [vmem:[%s3982_s30 + $0x48] sm:$0xff] %vm2344_vm2, %v2317_v63  ;;  %2528 = vst.msk [vmem:[%s3982_s30 + $0x58] sm:$0xff] %vm2344_vm2, %v2317_v63  ;;  %v2226_v37 = vadd.f32 1.0, %v3307_v41  ;;  %3326 = vpow2.f32 %v2508_v0  ;;  %v2510_v60 = vmul.f32 -1.442695, %v4023_v10  ;;  %v1199_v44 = vpop.f32.mrb[21].mxu1 }
 0x19f   : > { %v2062_v32 = vpop.f32.mrb[23].mxu0  ;;  %v3311_v18 = vpop.eup %3310  ;;  %2349 = vst.msk [vmem:[%s3982_s30 + $0x40] sm:$0xff] %vm2344_vm2, %v2316_v58  ;;  %2527 = vst.msk [vmem:[%s3982_s30 + $0x50] sm:$0xff] %vm2344_vm2, %v2316_v58  ;;  %v2229_v42 = vadd.f32 1.0, %v3309_v52  ;;  %3328 = vpow2.f32 %v2507_v12  ;;  %v3098_v48 = vadd.f32 %v3907_v19, %v1199_v44  ;;  %v2509_v24 = vmul.f32 -1.442695, %v4026_v1 }
 0x1a0   : > { %v3313_v59 = vpop.eup %3312  ;;  %v2319_v21 = vmul.f32 %v3311_v18, %v3935_v62  ;;  %3330 = vrcp.f32 %v2226_v37  ;;  %v4041_v61 = vadd.f32 %v3096_v56, %v3040_v8  ;;  %v2893_v35 = vpop.f32.mrb[22].mxu1 }
 0x1a1   : > { %3332 = vrcp.f32 %v2229_v42  ;;  %v2228_v14 = vadd.f32 1.0, %v3313_v59  ;;  %v4043_v13 = vadd.f32 %v3098_v48, %v2050_v51  ;;  %v3046_v2 = vpop.f32.mrb[24].mxu0  ;;  %v3315_v3 = vpop.eup %3314  ;;  %v3100_v15 = vadd.f32 %v2893_v35, %v3907_v19 }
 0x1a2   : > { %2352 = vst.msk [vmem:[%s3982_s30 + $0x68] sm:$0xff] %vm2344_vm2, %v2319_v21  ;;  %2530 = vst.msk [vmem:[%s3982_s30 + $0x78] sm:$0xff] %vm2344_vm2, %v2319_v21  ;;  %3334 = vpow2.f32 %v2510_v60  ;;  %v2512_v62 = vmul.f32 -1.442695, %v4041_v61  ;;  %v1213_v55 = vpop.f32.mrb[23].mxu1  ;;  %v2074_v16 = vpop.f32.mrb[25].mxu0  ;;  %v2318_v22 = vmul.f32 %v3315_v3, %v3938_v53 }
 0x1a3   : > { %v3317_v17 = vpop.eup %3316  ;;  %3336 = vrcp.f32 %v2228_v14  ;;  %v2511_v4 = vmul.f32 -1.442695, %v4043_v13  ;;  %v3102_v25 = vadd.f32 %v3907_v19, %v1213_v55  ;;  %v4055_v30 = vadd.f32 %v3100_v15, %v3043_v7 }
 0x1a4   : > { %v3319_v28 = vpop.eup %3318  ;;  %v2321_v29 = vmul.f32 %v3317_v17, %v3950_v26  ;;  %3338 = vpow2.f32 %v2509_v24  ;;  %2351 = vst.msk [vmem:[%s3982_s30 + $0x60] sm:$0xff] %vm2344_vm2, %v2318_v22  ;;  %2529 = vst.msk [vmem:[%s3982_s30 + $0x70] sm:$0xff] %vm2344_vm2, %v2318_v22  ;;  %v2896_v40 = vpop.f32.mrb[24].mxu1 }
 0x1a5   : > { %v3321_v36 = vpop.eup %3320  ;;  %v2231_v39 = vadd.f32 1.0, %v3319_v28  ;;  %3340 = vpow2.f32 %v2512_v62  ;;  %v4061_v53 = vadd.f32 %v3102_v25, %v2062_v32  ;;  %v3049_v6 = vpop.f32.mrb[26].mxu0  ;;  %v2514_v9 = vmul.f32 -1.442695, %v4055_v30 }
 0x1a6   : > { %v3323_v8 = vpop.eup %3322  ;;  %2354 = vst.msk [vmem:[%s3982_s30 + $0x88] sm:$0xff] %vm2344_vm2, %v2321_v29  ;;  %2532 = vst.msk [vmem:[%s3982_s30 + $0x98] sm:$0xff] %vm2344_vm2, %v2321_v29  ;;  %v2230_v26 = vadd.f32 1.0, %v3321_v36  ;;  %3342 = vpow2.f32 %v2511_v4  ;;  %v3104_v20 = vadd.f32 %v2896_v40, %v3907_v19  ;;  %v1227_v0 = vpop.f32.mrb[25].mxu1 }
 0x1a7   : > { %v2086_v34 = vpop.f32.mrb[27].mxu0  ;;  %v3325_v43 = vpop.eup %3324  ;;  %v2320_v51 = vmul.f32 %v3323_v8, %v3952_v27  ;;  %3344 = vrcp.f32 %v2231_v39  ;;  %v2513_v49 = vmul.f32 -1.442695, %v4061_v53  ;;  %v3106_v11 = vadd.f32 %v3907_v19, %v1227_v0 }
 0x1a8   : > { %v3327_v12 = vpop.eup %3326  ;;  %v2323_v31 = vmul.f32 %v3325_v43, %v3964_v23  ;;  %3346 = vrcp.f32 %v2230_v26  ;;  %v4073_v57 = vadd.f32 %v3104_v20, %v3046_v2  ;;  %v2899_v58 = vpop.f32.mrb[26].mxu1 }
 0x1a9   : > { %v3329_v63 = vpop.eup %3328  ;;  %2353 = vst.msk [vmem:[%s3982_s30 + $0x80] sm:$0xff] %vm2344_vm2, %v2320_v51  ;;  %2531 = vst.msk [vmem:[%s3982_s30 + $0x90] sm:$0xff] %vm2344_vm2, %v2320_v51  ;;  %v2233_v41 = vadd.f32 1.0, %v3327_v12  ;;  %3348 = vpow2.f32 %v2514_v9  ;;  %v4079_v27 = vadd.f32 %v3106_v11, %v2074_v16  ;;  %v3052_v46 = vpop.f32.mrb[28].mxu0  ;;  %v3108_v37 = vadd.f32 %v2899_v58, %v3907_v19 }
 0x1aa   : > { %v3331_v7 = vpop.eup %3330  ;;  %2356 = vst.msk [vmem:[%s3982_s30 + $0xa8] sm:$0xff] %vm2344_vm2, %v2323_v31  ;;  %2534 = vst.msk [vmem:[%s3982_s30 + $0xb8] sm:$0xff] %vm2344_vm2, %v2323_v31  ;;  %v2232_v23 = vadd.f32 1.0, %v3329_v63  ;;  %3350 = vpow2.f32 %v2513_v49  ;;  %v2516_v52 = vmul.f32 -1.442695, %v4073_v57  ;;  %v1241_v60 = vpop.f32.mrb[27].mxu1 }
 0x1ab   : > { %v2098_v56 = vpop.f32.mrb[29].mxu0  ;;  %v3333_v44 = vpop.eup %3332  ;;  %v2322_v32 = vmul.f32 %v3331_v7, %v3966_v33  ;;  %3352 = vrcp.f32 %v2233_v41  ;;  %v2515_v18 = vmul.f32 -1.442695, %v4079_v27  ;;  %v3110_v42 = vadd.f32 %v3907_v19, %v1241_v60 }
 0x1ac   : > { %v3335_v48 = vpop.eup %3334  ;;  %v2325_v59 = vmul.f32 %v3333_v44, %v3973_v45  ;;  %3354 = vrcp.f32 %v2232_v23  ;;  %v4091_v21 = vadd.f32 %v3108_v37, %v3049_v6  ;;  %v2902_v35 = vpop.f32.mrb[28].mxu1 }
 0x1ad   : > { %v3337_v24 = vpop.eup %3336  ;;  %2355 = vst.msk [vmem:[%s3982_s30 + $0xa0] sm:$0xff] %vm2344_vm2, %v2322_v32  ;;  %2533 = vst.msk [vmem:[%s3982_s30 + $0xb0] sm:$0xff] %vm2344_vm2, %v2322_v32  ;;  %v2235_v14 = vadd.f32 1.0, %v3335_v48  ;;  %3356 = vpow2.f32 %v2516_v52  ;;  %v4097_v33 = vadd.f32 %v3110_v42, %v2086_v34  ;;  %v3055_v2 = vpop.f32.mrb[30].mxu0  ;;  %v3112_v15 = vadd.f32 %v2902_v35, %v3907_v19 }
 0x1ae   : > { %v3339_v3 = vpop.eup %3338  ;;  %2358 = vst.msk [vmem:[%s3982_s30 + $0xc8] sm:$0xff] %vm2344_vm2, %v2325_v59  ;;  %2536 = vst.msk [vmem:[%s3982_s30 + $0xd8] sm:$0xff] %vm2344_vm2, %v2325_v59  ;;  %v2324_v45 = vmul.f32 %v3337_v24, %v3975_v54  ;;  %3358 = vpow2.f32 %v2515_v18  ;;  %v2518_v62 = vmul.f32 -1.442695, %v4091_v21  ;;  %v1255_v55 = vpop.f32.mrb[29].mxu1 }
 0x1af   : > { %v2110_v16 = vpop.f32.mrb[31].mxu0  ;;  %v3341_v17 = vpop.eup %3340  ;;  %3360 = vrcp.f32 %v2235_v14  ;;  %v2234_v22 = vadd.f32 1.0, %v3339_v3  ;;  %v3114_v4 = vadd.f32 %v3907_v19, %v1255_v55  ;;  %v2517_v54 = vmul.f32 -1.442695, %v4097_v33 }
 0x1b0   : > { %v3343_v25 = vpop.eup %3342  ;;  %2357 = vst.msk [vmem:[%s3982_s30 + $0xc0] sm:$0xff] %vm2344_vm2, %v2324_v45  ;;  %2535 = vst.msk [vmem:[%s3982_s30 + $0xd0] sm:$0xff] %vm2344_vm2, %v2324_v45  ;;  %v2237_v28 = vadd.f32 1.0, %v3341_v17  ;;  %3362 = vpow2.f32 %v2518_v62  ;;  %v4112_v29 = vadd.f32 %v3112_v15, %v3052_v46  ;;  %v2905_v6 = vpop.f32.mrb[30].mxu1 }
 0x1b1   : > { %v3345_v36 = vpop.eup %3344  ;;  %3364 = vrcp.f32 %v2234_v22  ;;  %v2236_v39 = vadd.f32 1.0, %v3343_v25  ;;  %v4114_v40 = vadd.f32 %v3114_v4, %v2098_v56  ;;  %v3116_v20 = vadd.f32 %v2905_v6, %v3907_v19  ;;  %v1269_v0 = vpop.f32.mrb[31].mxu1 }
 0x1b2   : > { %v3347_v8 = vpop.eup %3346  ;;  %v2327_v26 = vmul.f32 %v3345_v36, %v3987_v50  ;;  %3366 = vrcp.f32 %v2237_v28  ;;  %v2520_v9 = vmul.f32 -1.442695, %v4112_v29  ;;  %v3118_v51 = vadd.f32 %v3907_v19, %v1269_v0 }
 0x1b3   : > { %v3349_v34 = vpop.eup %3348  ;;  %v2326_v43 = vmul.f32 %v3347_v8, %v3990_v5  ;;  %3368 = vrcp.f32 %v2236_v39  ;;  %v2519_v11 = vmul.f32 -1.442695, %v4114_v40  ;;  %v4126_v12 = vadd.f32 %v3116_v20, %v3055_v2 }
 0x1b4   : > { %v3351_v49 = vpop.eup %3350  ;;  %2360 = vst.msk [vmem:[%s3982_s30 + $0xe8] sm:$0xff] %vm2344_vm2, %v2327_v26  ;;  %2538 = vst.msk [vmem:[%s3982_s30 + $0xf8] sm:$0xff] %vm2344_vm2, %v2327_v26  ;;  %v2239_v50 = vadd.f32 1.0, %v3349_v34  ;;  %3370 = vpow2.f32 %v2517_v54  ;;  %v4132_v19 = vadd.f32 %v3118_v51, %v2110_v16 }
 0x1b5   : > { %v3353_v31 = vpop.eup %3352  ;;  %2359 = vst.msk [vmem:[%s3982_s30 + $0xe0] sm:$0xff] %vm2344_vm2, %v2326_v43  ;;  %2537 = vst.msk [vmem:[%s3982_s30 + $0xf0] sm:$0xff] %vm2344_vm2, %v2326_v43  ;;  %v2238_v5 = vadd.f32 1.0, %v3351_v49  ;;  %3372 = vpow2.f32 %v2520_v9  ;;  %v2522_v58 = vmul.f32 -1.442695, %v4126_v12 }
 0x1b6   : > { %v3355_v63 = vpop.eup %3354  ;;  %v2329_v41 = vmul.f32 %v3353_v31, %v4005_v38  ;;  %3374 = vrcp.f32 %v2239_v50  ;;  %v2521_v37 = vmul.f32 -1.442695, %v4132_v19 }
 0x1b7   : > { %v3357_v46 = vpop.eup %3356  ;;  %v2328_v7 = vmul.f32 %v3355_v63, %v4008_v47  ;;  %3376 = vrcp.f32 %v2238_v5 }
 0x1b8   : > { %v3359_v23 = vpop.eup %3358  ;;  %2362 = vst.msk [vmem:[%s3982_s30 + $0x108] sm:$0xff] %vm2344_vm2, %v2329_v41  ;;  %2540 = vst.msk [vmem:[%s3982_s30 + $0x118] sm:$0xff] %vm2344_vm2, %v2329_v41  ;;  %v2241_v52 = vadd.f32 1.0, %v3357_v46  ;;  %3378 = vpow2.f32 %v2519_v11 }
 0x1b9   : > { %v3361_v60 = vpop.eup %3360  ;;  %2361 = vst.msk [vmem:[%s3982_s30 + $0x100] sm:$0xff] %vm2344_vm2, %v2328_v7  ;;  %2539 = vst.msk [vmem:[%s3982_s30 + $0x110] sm:$0xff] %vm2344_vm2, %v2328_v7  ;;  %v2240_v38 = vadd.f32 1.0, %v3359_v23  ;;  %3380 = vpow2.f32 %v2522_v58 }
 0x1ba   : > { %v3363_v47 = vpop.eup %3362  ;;  %v2331_v56 = vmul.f32 %v3361_v60, %v4023_v10  ;;  %3382 = vrcp.f32 %v2241_v52 }
 0x1bb   : > { %v3365_v44 = vpop.eup %3364  ;;  %3384 = vrcp.f32 %v2240_v38  ;;  %v2243_v32 = vadd.f32 1.0, %v3363_v47 }
 0x1bc   : > { %v3367_v18 = vpop.eup %3366  ;;  %2364 = vst.msk [vmem:[%s3982_s30 + $0x128] sm:$0xff] %vm2344_vm2, %v2331_v56  ;;  %2542 = vst.msk [vmem:[%s3982_s30 + $0x138] sm:$0xff] %vm2344_vm2, %v2331_v56  ;;  %v2330_v42 = vmul.f32 %v3365_v44, %v4026_v1  ;;  %3386 = vpow2.f32 %v2521_v37 }
 0x1bd   : > { %v3369_v48 = vpop.eup %3368  ;;  %v2333_v59 = vmul.f32 %v3367_v18, %v4041_v61  ;;  %3388 = vrcp.f32 %v2243_v32 }
 0x1be   : > { %v3371_v10 = vpop.eup %3370  ;;  %2363 = vst.msk [vmem:[%s3982_s30 + $0x120] sm:$0xff] %vm2344_vm2, %v2330_v42  ;;  %2541 = vst.msk [vmem:[%s3982_s30 + $0x130] sm:$0xff] %vm2344_vm2, %v2330_v42  ;;  %v2332_v24 = vmul.f32 %v3369_v48, %v4043_v13 }
 0x1bf   : > { %v3373_v14 = vpop.eup %3372  ;;  %2366 = vst.msk [vmem:[%s3982_s30 + $0x148] sm:$0xff] %vm2344_vm2, %v2333_v59  ;;  %2544 = vst.msk [vmem:[%s3982_s30 + $0x158] sm:$0xff] %vm2344_vm2, %v2333_v59  ;;  %v2242_v1 = vadd.f32 1.0, %v3371_v10 }
 0x1c0   : > { %v3375_v35 = vpop.eup %3374  ;;  %2365 = vst.msk [vmem:[%s3982_s30 + $0x140] sm:$0xff] %vm2344_vm2, %v2332_v24  ;;  %2543 = vst.msk [vmem:[%s3982_s30 + $0x150] sm:$0xff] %vm2344_vm2, %v2332_v24  ;;  %v2245_v61 = vadd.f32 1.0, %v3373_v14 }
 0x1c1   : > { %v3377_v2 = vpop.eup %3376  ;;  %v2335_v3 = vmul.f32 %v3375_v35, %v4055_v30  ;;  %3390 = vrcp.f32 %v2242_v1 }
 0x1c2   : > { %v3379_v13 = vpop.eup %3378  ;;  %v2334_v45 = vmul.f32 %v3377_v2, %v4061_v53  ;;  %3392 = vrcp.f32 %v2245_v61 }
 0x1c3   : > { %v3381_v62 = vpop.eup %3380  ;;  %2368 = vst.msk [vmem:[%s3982_s30 + $0x168] sm:$0xff] %vm2344_vm2, %v2335_v3  ;;  %2546 = vst.msk [vmem:[%s3982_s30 + $0x178] sm:$0xff] %vm2344_vm2, %v2335_v3  ;;  %v2244_v15 = vadd.f32 1.0, %v3379_v13 }
 0x1c4   : > { %v3383_v55 = vpop.eup %3382  ;;  %2367 = vst.msk [vmem:[%s3982_s30 + $0x160] sm:$0xff] %vm2344_vm2, %v2334_v45  ;;  %2545 = vst.msk [vmem:[%s3982_s30 + $0x170] sm:$0xff] %vm2344_vm2, %v2334_v45  ;;  %v2247_v30 = vadd.f32 1.0, %v3381_v62 }
 0x1c5   : > { %v3385_v53 = vpop.eup %3384  ;;  %v2337_v16 = vmul.f32 %v3383_v55, %v4073_v57  ;;  %3394 = vrcp.f32 %v2244_v15 }
 0x1c6   : > { %v3387_v17 = vpop.eup %3386  ;;  %v2336_v22 = vmul.f32 %v3385_v53, %v4079_v27  ;;  %3396 = vrcp.f32 %v2247_v30 }
 0x1c7   : > { %v3389_v4 = vpop.eup %3388  ;;  %2370 = vst.msk [vmem:[%s3982_s30 + $0x188] sm:$0xff] %vm2344_vm2, %v2337_v16  ;;  %2548 = vst.msk [vmem:[%s3982_s30 + $0x198] sm:$0xff] %vm2344_vm2, %v2337_v16  ;;  %v2246_v25 = vadd.f32 1.0, %v3387_v17 }
 0x1c8   : > { %2369 = vst.msk [vmem:[%s3982_s30 + $0x180] sm:$0xff] %vm2344_vm2, %v2336_v22  ;;  %2547 = vst.msk [vmem:[%s3982_s30 + $0x190] sm:$0xff] %vm2344_vm2, %v2336_v22  ;;  %v2339_v57 = vmul.f32 %v3389_v4, %v4091_v21 }
 0x1c9   : > { %3398 = vrcp.f32 %v2246_v25 }
 0x1ca   : > { %2372 = vst.msk [vmem:[%s3982_s30 + $0x1a8] sm:$0xff] %vm2344_vm2, %v2339_v57  ;;  %2550 = vst.msk [vmem:[%s3982_s30 + $0x1b8] sm:$0xff] %vm2344_vm2, %v2339_v57 }
 0x1cb   : > { %v3391_v27 = vpop.eup %3390 }
 0x1cc   : > { %v3393_v28 = vpop.eup %3392  ;;  %v2338_v54 = vmul.f32 %v3391_v27, %v4097_v33 }
 0x1cd   : > { %v2341_v36 = vmul.f32 %v3393_v28, %v4112_v29 }
 0x1ce   : > { %2371 = vst.msk [vmem:[%s3982_s30 + $0x1a0] sm:$0xff] %vm2344_vm2, %v2338_v54  ;;  %2549 = vst.msk [vmem:[%s3982_s30 + $0x1b0] sm:$0xff] %vm2344_vm2, %v2338_v54 }
 0x1cf   : > { %v3395_v21 = vpop.eup %3394  ;;  %2374 = vst.msk [vmem:[%s3982_s30 + $0x1c8] sm:$0xff] %vm2344_vm2, %v2341_v36  ;;  %2552 = vst.msk [vmem:[%s3982_s30 + $0x1d8] sm:$0xff] %vm2344_vm2, %v2341_v36 }
 0x1d0   : > { %v3397_v39 = vpop.eup %3396  ;;  %v2340_v6 = vmul.f32 %v3395_v21, %v4114_v40 }
 0x1d1   : > { %v2343_v8 = vmul.f32 %v3397_v39, %v4126_v12 }
 0x1d2   : > { %2373 = vst.msk [vmem:[%s3982_s30 + $0x1c0] sm:$0xff] %vm2344_vm2, %v2340_v6  ;;  %2551 = vst.msk [vmem:[%s3982_s30 + $0x1d0] sm:$0xff] %vm2344_vm2, %v2340_v6 }
 0x1d3   : > { %v3399_v33 = vpop.eup %3398  ;;  %2376 = vst.msk [vmem:[%s3982_s30 + $0x1e8] sm:$0xff] %vm2344_vm2, %v2343_v8  ;;  %2554 = vst.msk [vmem:[%s3982_s30 + $0x1f8] sm:$0xff] %vm2344_vm2, %v2343_v8 }
 0x1d4   : > { %v2342_v29 = vmul.f32 %v3399_v33, %v4132_v19 }
 0x1d6   : > { %2375 = vst.msk [vmem:[%s3982_s30 + $0x1e0] sm:$0xff] %vm2344_vm2, %v2342_v29  ;;  %2553 = vst.msk [vmem:[%s3982_s30 + $0x1f0] sm:$0xff] %vm2344_vm2, %v2342_v29 }
 0x1d7 PF: > { %s13_s14 = sadd.s32 1, %s3422_s14   ;;  %s4284_s12 = smov %s3418_s13 }
 0x1d8   : > { %p10_p6 = scmp.ge.s32.totalorder %s13_s14, 4   ;;  %s4285_s13 = smov %s4287_s15 }
 0x1da   :  { %12 = sbr.rel (!%p10_p6) target bundleno = 2 (0x2), region = 63 }

</bundles_post_ra>
